<compile_context>
chip_gen: v5e
topology: v5e:2x2
jax: 0.10.0
libtpu: 0.0.40
codegen_flags: <defaults>
</compile_context>

<pallas_src>
from functools import partial

import jax
import jax.numpy as jnp
from jax.experimental import pallas as pl
from jax.experimental.pallas import tpu as pltpu

HIDDEN = 64
OUT = 10
OUT_PAD = 128          # lane-dense padded logit width used *inside* the kernel only
MAX_TILE_B = 4096      # per-step row cap; keeps VMEM use small even on v5e (16 MiB scoped)


def mlp_kernel(x_ref, w1_ref, b1_ref, w2_ref, b2_ref, w3_ref, b3_ref,
               w4_ref, b4_ref, o_ref):
    # x_ref / w*_ref are bf16; b*_ref are f32; all accumulation in f32 on the MXU.

    # Layer 1: Linear(IN, 64) + ReLU
    h = jnp.dot(x_ref[...], w1_ref[...], preferred_element_type=jnp.float32) + b1_ref[...]
    h = jnp.maximum(h, 0.0)

    # Layer 2: Linear(64, 64) + ReLU
    h = jnp.dot(h.astype(jnp.bfloat16), w2_ref[...],
                preferred_element_type=jnp.float32) + b2_ref[...]
    h = jnp.maximum(h, 0.0)

    # Layer 3: Linear(64, 64) + ReLU
    h = jnp.dot(h.astype(jnp.bfloat16), w3_ref[...],
                preferred_element_type=jnp.float32) + b3_ref[...]
    h = jnp.maximum(h, 0.0)

    # Layer 4: Linear(64, 10) padded to 128 lanes for a full-width MXU result.
    # Padded columns have weight 0 and bias -1e30, so they never win the max and
    # their exp underflows cleanly to 0 in the softmax denominator.
    logits = jnp.dot(h.astype(jnp.bfloat16), w4_ref[...],
                     preferred_element_type=jnp.float32) + b4_ref[...]

    # Numerically stable log_softmax along the feature axis.
    m = jnp.max(logits, axis=1, keepdims=True)
    shifted = logits - m
    lse = jnp.log(jnp.sum(jnp.exp(shifted), axis=1, keepdims=True))

    # Store only the 10 real log-prob lanes (f32): 12.8x fewer HBM output bytes
    # than the padded 128-lane store.
    o_ref[...] = (shifted[:, :OUT] - lse).astype(o_ref.dtype)


def prepare_params(params):
    """One-time parameter prep: pad the last layer to 128 lanes, cast matmul operands to bf16."""
    (w1, b1), (w2, b2), (w3, b3), (w4, b4) = params
    w4p = jnp.zeros((HIDDEN, OUT_PAD), jnp.float32).at[:, :OUT].set(w4)
    b4p = jnp.full((1, OUT_PAD), -1e30, jnp.float32).at[:, :OUT].set(b4)
    return (w1.astype(jnp.bfloat16), b1,
            w2.astype(jnp.bfloat16), b2,
            w3.astype(jnp.bfloat16), b3,
            w4p.astype(jnp.bfloat16), b4p)


def _pick_tile_b(batch):
    """Aim for 2 grid steps (megacore-friendly on v7x, ~free elsewhere), cap rows per step."""
    tile = max(8, -(-batch // 2))            # ceil(B/2), at least 8 sublanes
    tile = ((tile + 7) // 8) * 8             # sublane-aligned
    return min(MAX_TILE_B, tile)


@partial(jax.jit, static_argnames=("tile_b",))
def _mlp_forward_impl(x, prepared, tile_b):
    w1b, b1, w2b, b2, w3b, b3, w4b, b4p = prepared
    B, IN = x.shape

    xb = x.astype(jnp.bfloat16)
    grid_b = pl.cdiv(B, tile_b)
    b_pad = grid_b * tile_b
    if b_pad != B:
        # Zero rows are harmless; fused into the jit'ed graph.
        xb = jnp.pad(xb, ((0, b_pad - B), (0, 0)))

    # x / out move per grid step; weights & biases use a constant index_map so they are
    # DMA'd once and stay resident in VMEM across the whole grid.
    x_spec = pl.BlockSpec((tile_b, IN), lambda i: (i, 0))
    out_spec = pl.BlockSpec((tile_b, OUT), lambda i: (i, 0))
    resident = lambda a: pl.BlockSpec(a.shape, lambda i: (0,) * a.ndim)

    flops = 2 * b_pad * (IN * HIDDEN + HIDDEN * HIDDEN * 2 + HIDDEN * OUT_PAD)
    weight_bytes = sum(int(a.size) * a.dtype.itemsize
                       for a in (w1b, b1, w2b, b2, w3b, b3, w4b, b4p))
    cost = pl.CostEstimate(
        flops=flops,
        transcendentals=b_pad * OUT_PAD,
        bytes_accessed=int(xb.size) * 2 + b_pad * OUT * 4 + weight_bytes,
    )

    out_padded = pl.pallas_call(
        mlp_kernel,
        out_shape=jax.ShapeDtypeStruct((b_pad, OUT), jnp.float32),
        grid=(grid_b,),
        in_specs=[x_spec,
                  resident(w1b), resident(b1),
                  resident(w2b), resident(b2),
                  resident(w3b), resident(b3),
                  resident(w4b), resident(b4p)],
        out_specs=out_spec,
        compiler_params=pltpu.CompilerParams(
            dimension_semantics=("parallel",)),
        cost_estimate=cost,
    )(xb, w1b, b1, w2b, b2, w3b, b3, w4b, b4p)

    # Slice away batch padding (fuses inside jit) -> real (B, 10) log-probs.
    return out_padded[:B]


def mlp_forward(x, prepared_params, *, tile_b=None):
    if tile_b is None:
        tile_b = _pick_tile_b(x.shape[0])
    return _mlp_forward_impl(x, prepared_params, tile_b)


def init_params(key, in_features):
    """Deterministic PyTorch-Linear-style init (uniform(-1/sqrt(fan_in), 1/sqrt(fan_in)))."""
    dims = [(in_features, HIDDEN), (HIDDEN, HIDDEN), (HIDDEN, HIDDEN), (HIDDEN, OUT)]
    params = []
    for (fan_in, fan_out) in dims:
        key, kw, kb = jax.random.split(key, 3)
        bound = 1.0 / jnp.sqrt(fan_in)
        # Stored as [in, out] so kernel computes x @ W (== torch's x @ W.T).
        w = jax.random.uniform(kw, (fan_in, fan_out), jnp.float32, -bound, bound)
        b = jax.random.uniform(kb, (1, fan_out), jnp.float32, -bound, bound)
        params.append((w, b))
    return params


def reference_forward(x, params):
    """Pure-JAX reference that mimics the kernel's bf16 matmul operands / f32 accumulation."""
    def r16(a):
        return a.astype(jnp.bfloat16).astype(jnp.float32)
    h = x
    for i, (w, b) in enumerate(params):
        h = r16(h) @ r16(w) + b
        if i < 3:
            h = jnp.maximum(h, 0.0)
    return jax.nn.log_softmax(h, axis=1)


if __name__ == "__main__":
    key = jax.random.PRNGKey(0)
    B, IN = 512, 32  # batch, input feature dim ("shape"); auto-tile -> 2 grid steps of 256

    kx, kp = jax.random.split(key)
    x = jax.random.normal(kx, (B, IN), jnp.float32)
    params = init_params(kp, IN)
    prepared = prepare_params(params)  # hoisted out of the hot path

    out = mlp_forward(x, prepared)
    out = jax.block_until_ready(out)

    ref = reference_forward(x, params)
    assert out.shape == (B, OUT)
    assert bool(jnp.all(jnp.isfinite(out))), "non-finite output"
    assert jnp.allclose(out, ref, atol=2e-3, rtol=2e-3), "mismatch vs reference"

    print("KERNEL_OK")
</pallas_src>

<mosaic_0001>
module attributes {stable_mosaic.version = 11 : i64} {
  func.func @mlp_kernel(%arg0: i32, %arg1: memref<256x32xbf16, #tpu.memory_space<vmem>>, %arg2: memref<32x64xbf16, #tpu.memory_space<vmem>>, %arg3: memref<1x64xf32, #tpu.memory_space<vmem>>, %arg4: memref<64x64xbf16, #tpu.memory_space<vmem>>, %arg5: memref<1x64xf32, #tpu.memory_space<vmem>>, %arg6: memref<64x64xbf16, #tpu.memory_space<vmem>>, %arg7: memref<1x64xf32, #tpu.memory_space<vmem>>, %arg8: memref<64x128xbf16, #tpu.memory_space<vmem>>, %arg9: memref<1x128xf32, #tpu.memory_space<vmem>>, %arg10: memref<256x10xf32, #tpu.memory_space<vmem>>) attributes {dimension_semantics = [#tpu.dimension_semantics<parallel>], iteration_bounds = array<i64: 2>, scalar_prefetch = 0 : i64, scratch_operands = 0 : i64, tpu.core_type = #tpu.core_type<tc>, window_params = [{transform_indices = @transform_0, window_bounds = array<i64: 256, 32>}, {pipeline_mode = #tpu.pipeline_mode<synchronous>, transform_indices = @transform_1, window_bounds = array<i64: 32, 64>}, {pipeline_mode = #tpu.pipeline_mode<synchronous>, transform_indices = @transform_2, window_bounds = array<i64: 1, 64>}, {pipeline_mode = #tpu.pipeline_mode<synchronous>, transform_indices = @transform_3, window_bounds = array<i64: 64, 64>}, {pipeline_mode = #tpu.pipeline_mode<synchronous>, transform_indices = @transform_4, window_bounds = array<i64: 1, 64>}, {pipeline_mode = #tpu.pipeline_mode<synchronous>, transform_indices = @transform_5, window_bounds = array<i64: 64, 64>}, {pipeline_mode = #tpu.pipeline_mode<synchronous>, transform_indices = @transform_6, window_bounds = array<i64: 1, 64>}, {pipeline_mode = #tpu.pipeline_mode<synchronous>, transform_indices = @transform_7, window_bounds = array<i64: 64, 128>}, {pipeline_mode = #tpu.pipeline_mode<synchronous>, transform_indices = @transform_8, window_bounds = array<i64: 1, 128>}, {transform_indices = @transform_9, window_bounds = array<i64: 256, 10>}]} {
    %c0 = arith.constant 0 : index
    %c0_0 = arith.constant 0 : index
    %0 = vector.load %arg1[%c0, %c0_0] : memref<256x32xbf16, #tpu.memory_space<vmem>>, vector<256x32xbf16>
    %c0_1 = arith.constant 0 : index
    %c0_2 = arith.constant 0 : index
    %1 = vector.load %arg2[%c0_1, %c0_2] : memref<32x64xbf16, #tpu.memory_space<vmem>>, vector<32x64xbf16>
    %cst = arith.constant dense<0.000000e+00> : vector<256x64xf32>
    %2 = tpu.matmul %0, %1, %cst {dimension_numbers = #tpu.dot_dimension_numbers<[1], [0], [0], [1], [0, 0, 1, 1], [], []>} : vector<256x32xbf16>, vector<32x64xbf16>, vector<256x64xf32> -> vector<256x64xf32>
    %c0_3 = arith.constant 0 : index
    %c0_4 = arith.constant 0 : index
    %3 = vector.load %arg3[%c0_3, %c0_4] : memref<1x64xf32, #tpu.memory_space<vmem>>, vector<1x64xf32>
    %4 = vector.broadcast %3 : vector<1x64xf32> to vector<256x64xf32>
    %5 = arith.addf %2, %4 : vector<256x64xf32>
    %cst_5 = arith.constant 0.000000e+00 : f32
    %6 = vector.broadcast %cst_5 : f32 to vector<256x64xf32>
    %7 = arith.maximumf %5, %6 : vector<256x64xf32>
    %8 = arith.truncf %7 : vector<256x64xf32> to vector<256x64xbf16>
    %c0_6 = arith.constant 0 : index
    %c0_7 = arith.constant 0 : index
    %9 = vector.load %arg4[%c0_6, %c0_7] : memref<64x64xbf16, #tpu.memory_space<vmem>>, vector<64x64xbf16>
    %cst_8 = arith.constant dense<0.000000e+00> : vector<256x64xf32>
    %10 = tpu.matmul %8, %9, %cst_8 {dimension_numbers = #tpu.dot_dimension_numbers<[1], [0], [0], [1], [0, 0, 1, 1], [], []>} : vector<256x64xbf16>, vector<64x64xbf16>, vector<256x64xf32> -> vector<256x64xf32>
    %c0_9 = arith.constant 0 : index
    %c0_10 = arith.constant 0 : index
    %11 = vector.load %arg5[%c0_9, %c0_10] : memref<1x64xf32, #tpu.memory_space<vmem>>, vector<1x64xf32>
    %12 = vector.broadcast %11 : vector<1x64xf32> to vector<256x64xf32>
    %13 = arith.addf %10, %12 : vector<256x64xf32>
    %cst_11 = arith.constant 0.000000e+00 : f32
    %14 = vector.broadcast %cst_11 : f32 to vector<256x64xf32>
    %15 = arith.maximumf %13, %14 : vector<256x64xf32>
    %16 = arith.truncf %15 : vector<256x64xf32> to vector<256x64xbf16>
    %c0_12 = arith.constant 0 : index
    %c0_13 = arith.constant 0 : index
    %17 = vector.load %arg6[%c0_12, %c0_13] : memref<64x64xbf16, #tpu.memory_space<vmem>>, vector<64x64xbf16>
    %cst_14 = arith.constant dense<0.000000e+00> : vector<256x64xf32>
    %18 = tpu.matmul %16, %17, %cst_14 {dimension_numbers = #tpu.dot_dimension_numbers<[1], [0], [0], [1], [0, 0, 1, 1], [], []>} : vector<256x64xbf16>, vector<64x64xbf16>, vector<256x64xf32> -> vector<256x64xf32>
    %c0_15 = arith.constant 0 : index
    %c0_16 = arith.constant 0 : index
    %19 = vector.load %arg7[%c0_15, %c0_16] : memref<1x64xf32, #tpu.memory_space<vmem>>, vector<1x64xf32>
    %20 = vector.broadcast %19 : vector<1x64xf32> to vector<256x64xf32>
    %21 = arith.addf %18, %20 : vector<256x64xf32>
    %cst_17 = arith.constant 0.000000e+00 : f32
    %22 = vector.broadcast %cst_17 : f32 to vector<256x64xf32>
    %23 = arith.maximumf %21, %22 : vector<256x64xf32>
    %24 = arith.truncf %23 : vector<256x64xf32> to vector<256x64xbf16>
    %c0_18 = arith.constant 0 : index
    %c0_19 = arith.constant 0 : index
    %25 = vector.load %arg8[%c0_18, %c0_19] : memref<64x128xbf16, #tpu.memory_space<vmem>>, vector<64x128xbf16>
    %cst_20 = arith.constant dense<0.000000e+00> : vector<256x128xf32>
    %26 = tpu.matmul %24, %25, %cst_20 {dimension_numbers = #tpu.dot_dimension_numbers<[1], [0], [0], [1], [0, 0, 1, 1], [], []>} : vector<256x64xbf16>, vector<64x128xbf16>, vector<256x128xf32> -> vector<256x128xf32>
    %c0_21 = arith.constant 0 : index
    %c0_22 = arith.constant 0 : index
    %27 = vector.load %arg9[%c0_21, %c0_22] : memref<1x128xf32, #tpu.memory_space<vmem>>, vector<1x128xf32>
    %28 = vector.broadcast %27 : vector<1x128xf32> to vector<256x128xf32>
    %29 = arith.addf %26, %28 : vector<256x128xf32>
    %cst_23 = arith.constant dense<0xFF800000> : vector<256xf32>
    %30 = vector.multi_reduction <maximumf>, %29, %cst_23 [1] : vector<256x128xf32> to vector<256xf32>
    %31 = vector.shape_cast %30 : vector<256xf32> to vector<256x1xf32>
    %32 = vector.broadcast %31 : vector<256x1xf32> to vector<256x128xf32>
    %33 = arith.subf %29, %32 : vector<256x128xf32>
    %34 = math.exp %33 : vector<256x128xf32>
    %cst_24 = arith.constant dense<0.000000e+00> : vector<256xf32>
    %35 = vector.multi_reduction <add>, %34, %cst_24 [1] : vector<256x128xf32> to vector<256xf32>
    %36 = vector.shape_cast %35 : vector<256xf32> to vector<256x1xf32>
    %37 = math.log %36 : vector<256x1xf32>
    %38 = vector.extract_strided_slice %33 {offsets = [0, 0], sizes = [256, 10], strides = [1, 1]} : vector<256x128xf32> to vector<256x10xf32>
    %39 = vector.broadcast %37 : vector<256x1xf32> to vector<256x10xf32>
    %40 = arith.subf %38, %39 : vector<256x10xf32>
    %c0_25 = arith.constant 0 : index
    %c0_26 = arith.constant 0 : index
    %41 = vector.load %arg10[%c0_25, %c0_26] : memref<256x10xf32, #tpu.memory_space<vmem>>, vector<256x10xf32>
    tpu.vector_store %arg10[%c0_25, %c0_26], %40 {strides = array<i32>} : memref<256x10xf32, #tpu.memory_space<vmem>>, vector<256x10xf32>,
    return
  }
  func.func @transform_0(%arg0: i32) -> (i32, i32) {
    %c0_i32 = arith.constant 0 : i32
    %c0_i32_0 = arith.constant 0 : i32
    return %arg0, %c0_i32 : i32, i32
  }
  func.func @transform_1(%arg0: i32) -> (i32, i32) {
    %c0_i32 = arith.constant 0 : i32
    %c0_i32_0 = arith.constant 0 : i32
    %c0_i32_1 = arith.constant 0 : i32
    return %c0_i32, %c0_i32_0 : i32, i32
  }
  func.func @transform_2(%arg0: i32) -> (i32, i32) {
    %c0_i32 = arith.constant 0 : i32
    %c0_i32_0 = arith.constant 0 : i32
    %c0_i32_1 = arith.constant 0 : i32
    return %c0_i32, %c0_i32_0 : i32, i32
  }
  func.func @transform_3(%arg0: i32) -> (i32, i32) {
    %c0_i32 = arith.constant 0 : i32
    %c0_i32_0 = arith.constant 0 : i32
    %c0_i32_1 = arith.constant 0 : i32
    return %c0_i32, %c0_i32_0 : i32, i32
  }
  func.func @transform_4(%arg0: i32) -> (i32, i32) {
    %c0_i32 = arith.constant 0 : i32
    %c0_i32_0 = arith.constant 0 : i32
    %c0_i32_1 = arith.constant 0 : i32
    return %c0_i32, %c0_i32_0 : i32, i32
  }
  func.func @transform_5(%arg0: i32) -> (i32, i32) {
    %c0_i32 = arith.constant 0 : i32
    %c0_i32_0 = arith.constant 0 : i32
    %c0_i32_1 = arith.constant 0 : i32
    return %c0_i32, %c0_i32_0 : i32, i32
  }
  func.func @transform_6(%arg0: i32) -> (i32, i32) {
    %c0_i32 = arith.constant 0 : i32
    %c0_i32_0 = arith.constant 0 : i32
    %c0_i32_1 = arith.constant 0 : i32
    return %c0_i32, %c0_i32_0 : i32, i32
  }
  func.func @transform_7(%arg0: i32) -> (i32, i32) {
    %c0_i32 = arith.constant 0 : i32
    %c0_i32_0 = arith.constant 0 : i32
    %c0_i32_1 = arith.constant 0 : i32
    return %c0_i32, %c0_i32_0 : i32, i32
  }
  func.func @transform_8(%arg0: i32) -> (i32, i32) {
    %c0_i32 = arith.constant 0 : i32
    %c0_i32_0 = arith.constant 0 : i32
    %c0_i32_1 = arith.constant 0 : i32
    return %c0_i32, %c0_i32_0 : i32, i32
  }
  func.func @transform_9(%arg0: i32) -> (i32, i32) {
    %c0_i32 = arith.constant 0 : i32
    %c0_i32_0 = arith.constant 0 : i32
    return %arg0, %c0_i32 : i32, i32
  }
}

</mosaic_0001>

<bundles_post_ra>
// kernel: _mlp_forward_impl.1
= control target key start
LH: loop header
LB: loop body
LE: loop exit
PB: predicated region body
PF: predicated region fallthrough
CT: control target
= control target key end

     0   :  { %s2103_s30 = smov 0   ;;  %s2718_s0 = inlined_call_operand.vmem [shape: bf16[512,32], index: 0, kind: input, shape index: {}]   ;;  %s2719_s1 = inlined_call_operand.vmem [shape: bf16[32,64], index: 1, kind: input, shape index: {}]   ;;  %s2720_s2 = inlined_call_operand.vmem [shape: f32[1,64], index: 2, kind: input, shape index: {}]   ;;  %s2721_s3 = inlined_call_operand.vmem [shape: bf16[64,64], index: 3, kind: input, shape index: {}]   ;;  %s2722_s4 = inlined_call_operand.vmem [shape: f32[1,64], index: 4, kind: input, shape index: {}]   ;;  %s2723_s5 = inlined_call_operand.vmem [shape: bf16[64,64], index: 5, kind: input, shape index: {}]   ;;  %s2724_s6 = inlined_call_operand.vmem [shape: f32[1,64], index: 6, kind: input, shape index: {}]   ;;  %s2725_s7 = inlined_call_operand.vmem [shape: bf16[64,128], index: 7, kind: input, shape index: {}]   ;;  %s2726_s8 = inlined_call_operand.vmem [shape: f32[1,128], index: 8, kind: input, shape index: {}]   ;;  %s2727_s9 = inlined_call_operand.vmem [shape: f32[512,10], index: 9, kind: output, shape index: {}]  }
   0x1 LB: > { %s1680_s10 = sadd.s32 4294967295, %s2051_s30   ;;  %p1684_p0 = scmp.ge.s32.totalorder %s2051_s30, 1  ;;  %s2051_s30 = sphi %s2103_s30, %s19_s30  }
   0x2   : > { %p288_p1 = scmp.lt.s32.totalorder %s2051_s30, 3 }
   0x4   : > { %p289_p2 = pnand %p1684_p0, %p288_p1 }
   0x5   : > { %s1685_s13 = sshll.u32 (!%p289_p2), %s1680_s10, 5 }
   0x6   : > { %292 = sbr.rel (%p289_p2) target bundleno = 1082 (0x43a), region = 56  ;;  %p325_p3 = scmp.lt.s32.totalorder (!%p289_p2), %s1685_s13, 63 }
   0xb   : > { %v1892_v0 = vld [vmem:[%s2719_s1 + $0x8] sm:$0xff]  ;;  %v1891_v1 = vld [vmem:[%s2719_s1] sm:$0xff]  ;;  %s2729_s13 = smov (!%p325_p3, %s1685_s13), 63  ;;  %vm469_vm0 = vcmask 261120   ;;  %v1896_v8 = vld [vmem:[%s2721_s3 + $0x18] sm:$0xff]  ;;  %vm691_vm1 = vcmask 523264  }
   0xc   : > { %524 = vmatpush.bf16.msra.mxu0 %v1892_v0  ;;  %s1686_s16 = sshll.u32 %s2729_s13, 2  ;;  %744 = vmatpush.bf16.msra.mxu1 %v1896_v8  ;;  %v1895_v10 = vld [vmem:[%s2721_s3 + $0x10] sm:$0xff]  ;;  %v1894_v11 = vld [vmem:[%s2721_s3 + $0x8] sm:$0xff]  ;;  %v1893_v12 = vld [vmem:[%s2721_s3] sm:$0xff]  ;;  %s1688_s14 = sshll.u32 %s2729_s13, 3  ;;  %vm1591_vm2 = vcmask 80896  }
   0xd   : > { %s2123_s19 = scalar_lea.vmem %s2718_s0, %s1686_s16  ;;  %v2157_v16 = vld [vmem:[%s2720_s2] ss:$0 sm:$0xff]  ;;  %v1899_v8 = vld [vmem:[%s2723_s5 + $0x10] sm:$0xff]  ;;  %s2556_s17 = scalar_lea.vmem %s2727_s9, %s1688_s14 }
   0xe   : > { %v1875_v2 = vld [vmem:[%s2123_s19] sm:$0xff]  ;;  %v1876_v3 = vld [vmem:[%s2123_s19 + $0x8] sm:$0xff]  ;;  %v1877_v4 = vld [vmem:[%s2123_s19 + $0x10] sm:$0xff] }
   0xf   : > { %v1878_v5 = vld [vmem:[%s2123_s19 + $0x18] sm:$0xff]  ;;  %v1879_v6 = vld [vmem:[%s2123_s19 + $0x20] sm:$0xff]  ;;  %v1880_v7 = vld [vmem:[%s2123_s19 + $0x28] sm:$0xff] }
  0x10   : > { %525 = vmatpush.bf16.msra.mxu0 %v1891_v1  ;;  %v1881_v9 = vld [vmem:[%s2123_s19 + $0x30] sm:$0xff]  ;;  %745 = vmatpush.bf16.msra.mxu1 %v1895_v10  ;;  %v1882_v13 = vld [vmem:[%s2123_s19 + $0x38] sm:$0xff]  ;;  %v1883_v14 = vld [vmem:[%s2123_s19 + $0x40] sm:$0xff] }
  0x11   : > { %v1884_v23 = vld [vmem:[%s2123_s19 + $0x48] sm:$0xff]  ;;  %v1885_v31 = vld [vmem:[%s2123_s19 + $0x50] sm:$0xff]  ;;  %v1886_v39 = vld [vmem:[%s2123_s19 + $0x58] sm:$0xff] }
  0x12   : > { %v1887_v47 = vld [vmem:[%s2123_s19 + $0x60] sm:$0xff]  ;;  %v1888_v55 = vld [vmem:[%s2123_s19 + $0x68] sm:$0xff]  ;;  %v1889_v63 = vld [vmem:[%s2123_s19 + $0x70] sm:$0xff] }
  0x13   : > { %1761 = vmatmul.msk.bf16.vlgmr.msra.gmra.mxu0 %vm469_vm0, %v1875_v2 }
  0x14   : > { %746 = vmatpush.bf16.msra.mxu1 %v1894_v11  ;;  %v1898_v11 = vld [vmem:[%s2723_s5 + $0x8] sm:$0xff] }
  0x18   : > { %747 = vmatpush.bf16.msra.mxu1 %v1893_v12  ;;  %v1897_v12 = vld [vmem:[%s2723_s5] sm:$0xff] }
  0x23   : > { %1762 = vmatmul.msk.bf16.gmra.mxu0 %vm469_vm0, %v1876_v3 }
  0x33   : > { %1763 = vmatmul.msk.bf16.gmra.mxu0 %vm469_vm0, %v1877_v4  ;;  %v1900_v4 = vld [vmem:[%s2723_s5 + $0x18] sm:$0xff] }
  0x34   : > { %965 = vmatpush.bf16.msra.mxu2 %v1900_v4 }
  0x38   : > { %966 = vmatpush.bf16.msra.mxu2 %v1899_v8 }
  0x3c   : > { %967 = vmatpush.bf16.msra.mxu2 %v1898_v11 }
  0x40   : > { %968 = vmatpush.bf16.msra.mxu2 %v1897_v12 }
  0x43   : > { %1764 = vmatmul.msk.bf16.gmra.mxu0 %vm469_vm0, %v1878_v5 }
  0x53   : > { %1765 = vmatmul.msk.bf16.gmra.mxu0 %vm469_vm0, %v1879_v6 }
  0x63   : > { %1766 = vmatmul.msk.bf16.gmra.mxu0 %vm469_vm0, %v1880_v7 }
  0x73   : > { %1767 = vmatmul.msk.bf16.gmra.mxu0 %vm469_vm0, %v1881_v9  ;;  %v1890_v9 = vld [vmem:[%s2123_s19 + $0x78] sm:$0xff] }
  0x83   : > { %1768 = vmatmul.msk.bf16.gmra.mxu0 %vm469_vm0, %v1882_v13 }
  0x90   : > { %v527_v15 = vpop.f32.mrf.mxu0 }
  0x91   : > { %v528_v17 = vadd.f32 %v2157_v16, %v527_v15 }
  0x93   : > { %1769 = vmatmul.msk.bf16.gmra.mxu0 %vm469_vm0, %v1883_v14  ;;  %v607_v20 = vmax.f32 %v528_v17, 0.0 }
  0x98   : > { %v529_v18 = vpop.f32.mrf.mxu0 }
  0x99   : > { %v530_v19 = vadd.f32 %v2157_v16, %v529_v18 }
  0x9b   : > { %v608_v21 = vmax.f32 %v530_v19, 0.0 }
  0x9d   : > { %v639_v22 = vpack.c.bf16 %v608_v21, %v607_v20 }
  0x9f   : > { %1793 = vmatmul.msk.bf16.vlgmr.msra.gmra.mxu1 %vm691_vm1, %v639_v22 }
  0xa0   : > { %v532_v24 = vpop.f32.mrf.mxu0 }
  0xa1   : > { %v533_v25 = vadd.f32 %v2157_v16, %v532_v24 }
  0xa3   : > { %1770 = vmatmul.msk.bf16.gmra.mxu0 %vm469_vm0, %v1884_v23  ;;  %v609_v28 = vmax.f32 %v533_v25, 0.0 }
  0xa8   : > { %v534_v26 = vpop.f32.mrf.mxu0 }
  0xa9   : > { %v535_v27 = vadd.f32 %v2157_v16, %v534_v26 }
  0xab   : > { %v610_v29 = vmax.f32 %v535_v27, 0.0 }
  0xad   : > { %v640_v30 = vpack.c.bf16 %v610_v29, %v609_v28  ;;  %v2215_v28 = vld [vmem:[%s2722_s4] ss:$0 sm:$0xff] }
  0xaf   : > { %1794 = vmatmul.msk.bf16.gmra.mxu1 %vm691_vm1, %v640_v30 }
  0xb0   : > { %v537_v32 = vpop.f32.mrf.mxu0 }
  0xb1   : > { %v538_v33 = vadd.f32 %v2157_v16, %v537_v32 }
  0xb3   : > { %1771 = vmatmul.msk.bf16.gmra.mxu0 %vm469_vm0, %v1885_v31  ;;  %v611_v36 = vmax.f32 %v538_v33, 0.0 }
  0xb8   : > { %v539_v34 = vpop.f32.mrf.mxu0 }
  0xb9   : > { %v540_v35 = vadd.f32 %v2157_v16, %v539_v34 }
  0xbb   : > { %v612_v37 = vmax.f32 %v540_v35, 0.0 }
  0xbd   : > { %v641_v38 = vpack.c.bf16 %v612_v37, %v611_v36 }
  0xbf   : > { %1795 = vmatmul.msk.bf16.gmra.mxu1 %vm691_vm1, %v641_v38 }
  0xc0   : > { %v542_v40 = vpop.f32.mrf.mxu0 }
  0xc1   : > { %v543_v41 = vadd.f32 %v2157_v16, %v542_v40 }
  0xc3   : > { %1772 = vmatmul.msk.bf16.gmra.mxu0 %vm469_vm0, %v1886_v39  ;;  %v613_v44 = vmax.f32 %v543_v41, 0.0 }
  0xc8   : > { %v544_v42 = vpop.f32.mrf.mxu0 }
  0xc9   : > { %v545_v43 = vadd.f32 %v2157_v16, %v544_v42 }
  0xcb   : > { %v614_v45 = vmax.f32 %v545_v43, 0.0 }
  0xcd   : > { %v642_v46 = vpack.c.bf16 %v614_v45, %v613_v44 }
  0xcf   : > { %1796 = vmatmul.msk.bf16.gmra.mxu1 %vm691_vm1, %v642_v46 }
  0xd0   : > { %v547_v48 = vpop.f32.mrf.mxu0 }
  0xd1   : > { %v548_v49 = vadd.f32 %v2157_v16, %v547_v48 }
  0xd3   : > { %1773 = vmatmul.msk.bf16.gmra.mxu0 %vm469_vm0, %v1887_v47  ;;  %v615_v52 = vmax.f32 %v548_v49, 0.0 }
  0xd8   : > { %v549_v50 = vpop.f32.mrf.mxu0 }
  0xd9   : > { %v550_v51 = vadd.f32 %v2157_v16, %v549_v50 }
  0xdb   : > { %v616_v53 = vmax.f32 %v550_v51, 0.0 }
  0xdd   : > { %v643_v54 = vpack.c.bf16 %v616_v53, %v615_v52 }
  0xdf   : > { %1797 = vmatmul.msk.bf16.gmra.mxu1 %vm691_vm1, %v643_v54 }
  0xe0   : > { %v552_v56 = vpop.f32.mrf.mxu0 }
  0xe1   : > { %v553_v57 = vadd.f32 %v2157_v16, %v552_v56 }
  0xe3   : > { %1774 = vmatmul.msk.bf16.gmra.mxu0 %vm469_vm0, %v1888_v55  ;;  %v617_v60 = vmax.f32 %v553_v57, 0.0 }
  0xe8   : > { %v554_v58 = vpop.f32.mrf.mxu0 }
  0xe9   : > { %v555_v59 = vadd.f32 %v2157_v16, %v554_v58 }
  0xeb   : > { %v618_v61 = vmax.f32 %v555_v59, 0.0 }
  0xed   : > { %v644_v62 = vpack.c.bf16 %v618_v61, %v617_v60 }
  0xef   : > { %1798 = vmatmul.msk.bf16.gmra.mxu1 %vm691_vm1, %v644_v62 }
  0xf0   : > { %v557_v0 = vpop.f32.mrf.mxu0 }
  0xf1   : > { %v558_v1 = vadd.f32 %v2157_v16, %v557_v0 }
  0xf3   : > { %1775 = vmatmul.msk.bf16.gmra.mxu0 %vm469_vm0, %v1889_v63  ;;  %v619_v5 = vmax.f32 %v558_v1, 0.0 }
  0xf8   : > { %v559_v2 = vpop.f32.mrf.mxu0 }
  0xf9   : > { %v560_v3 = vadd.f32 %v2157_v16, %v559_v2 }
  0xfb   : > { %v620_v6 = vmax.f32 %v560_v3, 0.0 }
  0xfd   : > { %v645_v7 = vpack.c.bf16 %v620_v6, %v619_v5 }
  0xff   : > { %1799 = vmatmul.msk.bf16.gmra.mxu1 %vm691_vm1, %v645_v7 }
 0x100   : > { %v562_v10 = vpop.f32.mrf.mxu0 }
 0x101   : > { %v563_v13 = vadd.f32 %v2157_v16, %v562_v10 }
 0x103   : > { %1776 = vmatmul.msk.bf16.gmra.mxu0 %vm469_vm0, %v1890_v9  ;;  %v621_v17 = vmax.f32 %v563_v13, 0.0 }
 0x108   : > { %v564_v14 = vpop.f32.mrf.mxu0 }
 0x109   : > { %v565_v15 = vadd.f32 %v2157_v16, %v564_v14 }
 0x10b   : > { %v622_v18 = vmax.f32 %v565_v15, 0.0 }
 0x10d   : > { %v646_v19 = vpack.c.bf16 %v622_v18, %v621_v17 }
 0x10f   : > { %1800 = vmatmul.msk.bf16.gmra.mxu1 %vm691_vm1, %v646_v19 }
 0x110   : > { %v567_v20 = vpop.f32.mrf.mxu0 }
 0x111   : > { %v568_v21 = vadd.f32 %v2157_v16, %v567_v20 }
 0x113   : > { %v623_v24 = vmax.f32 %v568_v21, 0.0 }
 0x118   : > { %v569_v22 = vpop.f32.mrf.mxu0 }
 0x119   : > { %v570_v23 = vadd.f32 %v2157_v16, %v569_v22 }
 0x11b   : > { %v624_v25 = vmax.f32 %v570_v23, 0.0 }
 0x11c   : > { %v749_v26 = vpop.f32.mrf.mxu1 }
 0x11d   : > { %v647_v27 = vpack.c.bf16 %v624_v25, %v623_v24  ;;  %v750_v30 = vadd.f32 %v2215_v28, %v749_v26 }
 0x11f   : > { %1801 = vmatmul.msk.bf16.gmra.mxu1 %vm691_vm1, %v647_v27  ;;  %v829_v33 = vmax.f32 %v750_v30, 0.0 }
 0x120   : > { %v572_v29 = vpop.f32.mrf.mxu0 }
 0x121   : > { %v573_v34 = vadd.f32 %v2157_v16, %v572_v29 }
 0x123   : > { %v625_v39 = vmax.f32 %v573_v34, 0.0 }
 0x124   : > { %v751_v31 = vpop.f32.mrf.mxu1 }
 0x125   : > { %v752_v32 = vadd.f32 %v2215_v28, %v751_v31 }
 0x127   : > { %v830_v35 = vmax.f32 %v752_v32, 0.0 }
 0x128   : > { %v574_v36 = vpop.f32.mrf.mxu0 }
 0x129   : > { %v575_v37 = vadd.f32 %v2157_v16, %v574_v36  ;;  %v861_v38 = vpack.c.bf16 %v830_v35, %v829_v33 }
 0x12b   : > { %v626_v40 = vmax.f32 %v575_v37, 0.0  ;;  %1825 = vmatmul.msk.bf16.vlgmr.msra.gmra.mxu2 %vm691_vm1, %v861_v38 }
 0x12c   : > { %v754_v41 = vpop.f32.mrf.mxu1 }
 0x12d   : > { %v648_v42 = vpack.c.bf16 %v626_v40, %v625_v39  ;;  %v755_v44 = vadd.f32 %v2215_v28, %v754_v41 }
 0x12f   : > { %1802 = vmatmul.msk.bf16.gmra.mxu1 %vm691_vm1, %v648_v42  ;;  %v831_v47 = vmax.f32 %v755_v44, 0.0 }
 0x130   : > { %v577_v43 = vpop.f32.mrf.mxu0 }
 0x131   : > { %v578_v48 = vadd.f32 %v2157_v16, %v577_v43 }
 0x133   : > { %v627_v53 = vmax.f32 %v578_v48, 0.0 }
 0x134   : > { %v756_v45 = vpop.f32.mrf.mxu1 }
 0x135   : > { %v757_v46 = vadd.f32 %v2215_v28, %v756_v45 }
 0x137   : > { %v832_v49 = vmax.f32 %v757_v46, 0.0 }
 0x138   : > { %v579_v50 = vpop.f32.mrf.mxu0 }
 0x139   : > { %v580_v51 = vadd.f32 %v2157_v16, %v579_v50  ;;  %v862_v52 = vpack.c.bf16 %v832_v49, %v831_v47 }
 0x13b   : > { %v628_v54 = vmax.f32 %v580_v51, 0.0  ;;  %1826 = vmatmul.msk.bf16.gmra.mxu2 %vm691_vm1, %v862_v52 }
 0x13c   : > { %v759_v55 = vpop.f32.mrf.mxu1 }
 0x13d   : > { %v649_v56 = vpack.c.bf16 %v628_v54, %v627_v53  ;;  %v760_v58 = vadd.f32 %v2215_v28, %v759_v55 }
 0x13f   : > { %1803 = vmatmul.msk.bf16.gmra.mxu1 %vm691_vm1, %v649_v56  ;;  %v833_v61 = vmax.f32 %v760_v58, 0.0 }
 0x140   : > { %v582_v57 = vpop.f32.mrf.mxu0 }
 0x141   : > { %v583_v62 = vadd.f32 %v2157_v16, %v582_v57 }
 0x143   : > { %v629_v3 = vmax.f32 %v583_v62, 0.0 }
 0x144   : > { %v761_v59 = vpop.f32.mrf.mxu1 }
 0x145   : > { %v762_v60 = vadd.f32 %v2215_v28, %v761_v59 }
 0x147   : > { %v834_v63 = vmax.f32 %v762_v60, 0.0 }
 0x148   : > { %v584_v0 = vpop.f32.mrf.mxu0 }
 0x149   : > { %v585_v1 = vadd.f32 %v2157_v16, %v584_v0  ;;  %v863_v2 = vpack.c.bf16 %v834_v63, %v833_v61  ;;  %v1904_v0 = vld [vmem:[%s2725_s7 + $0x18] sm:$0xff] }
 0x14a   : > { %1186 = vmatpush.bf16.msra.mxu3 %v1904_v0 }
 0x14b   : > { %v630_v4 = vmax.f32 %v585_v1, 0.0  ;;  %1827 = vmatmul.msk.bf16.gmra.mxu2 %vm691_vm1, %v863_v2  ;;  %v1903_v2 = vld [vmem:[%s2725_s7 + $0x10] sm:$0xff] }
 0x14c   : > { %v764_v5 = vpop.f32.mrf.mxu1 }
 0x14d   : > { %v650_v6 = vpack.c.bf16 %v630_v4, %v629_v3  ;;  %v765_v8 = vadd.f32 %v2215_v28, %v764_v5  ;;  %v1902_v4 = vld [vmem:[%s2725_s7 + $0x8] sm:$0xff] }
 0x14e   : > { %1187 = vmatpush.bf16.msra.mxu3 %v1903_v2 }
 0x14f   : > { %1804 = vmatmul.msk.bf16.gmra.mxu1 %vm691_vm1, %v650_v6  ;;  %v835_v11 = vmax.f32 %v765_v8, 0.0  ;;  %v1901_v8 = vld [vmem:[%s2725_s7] sm:$0xff] }
 0x150   : > { %v587_v7 = vpop.f32.mrf.mxu0 }
 0x151   : > { %v588_v12 = vadd.f32 %v2157_v16, %v587_v7 }
 0x152   : > { %1188 = vmatpush.bf16.msra.mxu3 %v1902_v4 }
 0x153   : > { %v631_v18 = vmax.f32 %v588_v12, 0.0 }
 0x154   : > { %v766_v9 = vpop.f32.mrf.mxu1 }
 0x155   : > { %v767_v10 = vadd.f32 %v2215_v28, %v766_v9 }
 0x156   : > { %1189 = vmatpush.bf16.msra.mxu3 %v1901_v8 }
 0x157   : > { %v836_v13 = vmax.f32 %v767_v10, 0.0 }
 0x158   : > { %v589_v14 = vpop.f32.mrf.mxu0 }
 0x159   : > { %v590_v15 = vadd.f32 %v2157_v16, %v589_v14  ;;  %v864_v17 = vpack.c.bf16 %v836_v13, %v835_v11 }
 0x15b   : > { %v632_v19 = vmax.f32 %v590_v15, 0.0  ;;  %1828 = vmatmul.msk.bf16.gmra.mxu2 %vm691_vm1, %v864_v17 }
 0x15c   : > { %v769_v20 = vpop.f32.mrf.mxu1 }
 0x15d   : > { %v651_v21 = vpack.c.bf16 %v632_v19, %v631_v18  ;;  %v770_v23 = vadd.f32 %v2215_v28, %v769_v20  ;;  %v2281_v20 = vld [vmem:[%s2724_s6] ss:$0 sm:$0xff] }
 0x15f   : > { %1805 = vmatmul.msk.bf16.gmra.mxu1 %vm691_vm1, %v651_v21  ;;  %v837_v26 = vmax.f32 %v770_v23, 0.0 }
 0x160   : > { %v592_v22 = vpop.f32.mrf.mxu0 }
 0x161   : > { %v593_v27 = vadd.f32 %v2157_v16, %v592_v22 }
 0x163   : > { %v633_v33 = vmax.f32 %v593_v27, 0.0 }
 0x164   : > { %v771_v24 = vpop.f32.mrf.mxu1 }
 0x165   : > { %v772_v25 = vadd.f32 %v2215_v28, %v771_v24 }
 0x167   : > { %v838_v29 = vmax.f32 %v772_v25, 0.0 }
 0x168   : > { %v594_v30 = vpop.f32.mrf.mxu0 }
 0x169   : > { %v865_v31 = vpack.c.bf16 %v838_v29, %v837_v26  ;;  %v595_v32 = vadd.f32 %v2157_v16, %v594_v30 }
 0x16b   : > { %v634_v34 = vmax.f32 %v595_v32, 0.0  ;;  %1829 = vmatmul.msk.bf16.gmra.mxu2 %vm691_vm1, %v865_v31 }
 0x16c   : > { %v774_v35 = vpop.f32.mrf.mxu1 }
 0x16d   : > { %v652_v36 = vpack.c.bf16 %v634_v34, %v633_v33  ;;  %v775_v38 = vadd.f32 %v2215_v28, %v774_v35 }
 0x16f   : > { %1806 = vmatmul.msk.bf16.gmra.mxu1 %vm691_vm1, %v652_v36  ;;  %v839_v41 = vmax.f32 %v775_v38, 0.0 }
 0x170   : > { %v597_v37 = vpop.f32.mrf.mxu0 }
 0x171   : > { %v598_v42 = vadd.f32 %v2157_v16, %v597_v37 }
 0x173   : > { %v635_v47 = vmax.f32 %v598_v42, 0.0 }
 0x174   : > { %v776_v39 = vpop.f32.mrf.mxu1 }
 0x175   : > { %v777_v40 = vadd.f32 %v2215_v28, %v776_v39 }
 0x177   : > { %v840_v43 = vmax.f32 %v777_v40, 0.0 }
 0x178   : > { %v599_v44 = vpop.f32.mrf.mxu0 }
 0x179   : > { %v866_v45 = vpack.c.bf16 %v840_v43, %v839_v41  ;;  %v600_v46 = vadd.f32 %v2157_v16, %v599_v44 }
 0x17b   : > { %v636_v48 = vmax.f32 %v600_v46, 0.0  ;;  %1830 = vmatmul.msk.bf16.gmra.mxu2 %vm691_vm1, %v866_v45 }
 0x17c   : > { %v779_v49 = vpop.f32.mrf.mxu1 }
 0x17d   : > { %v653_v50 = vpack.c.bf16 %v636_v48, %v635_v47  ;;  %v780_v52 = vadd.f32 %v2215_v28, %v779_v49 }
 0x17f   : > { %1807 = vmatmul.msk.bf16.gmra.mxu1 %vm691_vm1, %v653_v50  ;;  %v841_v55 = vmax.f32 %v780_v52, 0.0 }
 0x180   : > { %v602_v51 = vpop.f32.mrf.mxu0 }
 0x181   : > { %v603_v56 = vadd.f32 %v2157_v16, %v602_v51 }
 0x183   : > { %v637_v61 = vmax.f32 %v603_v56, 0.0 }
 0x184   : > { %v781_v53 = vpop.f32.mrf.mxu1 }
 0x185   : > { %v782_v54 = vadd.f32 %v2215_v28, %v781_v53 }
 0x187   : > { %v842_v57 = vmax.f32 %v782_v54, 0.0 }
 0x188   : > { %v604_v58 = vpop.f32.mrf.mxu0 }
 0x189   : > { %v867_v59 = vpack.c.bf16 %v842_v57, %v841_v55  ;;  %v605_v60 = vadd.f32 %v2157_v16, %v604_v58 }
 0x18b   : > { %v638_v62 = vmax.f32 %v605_v60, 0.0  ;;  %1831 = vmatmul.msk.bf16.gmra.mxu2 %vm691_vm1, %v867_v59 }
 0x18c   : > { %v784_v63 = vpop.f32.mrf.mxu1 }
 0x18d   : > { %v654_v1 = vpack.c.bf16 %v638_v62, %v637_v61  ;;  %v785_v16 = vadd.f32 %v2215_v28, %v784_v63 }
 0x18f   : > { %1808 = vmatmul.msk.bf16.gmra.mxu1 %vm691_vm1, %v654_v1  ;;  %v843_v6 = vmax.f32 %v785_v16, 0.0 }
 0x194   : > { %v786_v3 = vpop.f32.mrf.mxu1 }
 0x195   : > { %v787_v5 = vadd.f32 %v2215_v28, %v786_v3 }
 0x197   : > { %v844_v7 = vmax.f32 %v787_v5, 0.0 }
 0x199   : > { %v868_v9 = vpack.c.bf16 %v844_v7, %v843_v6 }
 0x19b   : > { %1832 = vmatmul.msk.bf16.gmra.mxu2 %vm691_vm1, %v868_v9 }
 0x19c   : > { %v789_v10 = vpop.f32.mrf.mxu1 }
 0x19d   : > { %v790_v11 = vadd.f32 %v2215_v28, %v789_v10 }
 0x19f   : > { %v845_v14 = vmax.f32 %v790_v11, 0.0 }
 0x1a4   : > { %v791_v12 = vpop.f32.mrf.mxu1 }
 0x1a5   : > { %v792_v13 = vadd.f32 %v2215_v28, %v791_v12 }
 0x1a7   : > { %v846_v15 = vmax.f32 %v792_v13, 0.0 }
 0x1a9   : > { %v869_v17 = vpack.c.bf16 %v846_v15, %v845_v14 }
 0x1ab   : > { %1833 = vmatmul.msk.bf16.gmra.mxu2 %vm691_vm1, %v869_v17 }
 0x1ac   : > { %v794_v18 = vpop.f32.mrf.mxu1 }
 0x1ad   : > { %v795_v21 = vadd.f32 %v2215_v28, %v794_v18 }
 0x1ae   : > { %v970_v19 = vpop.f32.mrf.mxu2 }
 0x1af   : > { %v971_v23 = vadd.f32 %v2281_v20, %v970_v19  ;;  %v847_v26 = vmax.f32 %v795_v21, 0.0 }
 0x1b1   : > { %v1050_v30 = vmax.f32 %v971_v23, 0.0 }
 0x1b4   : > { %v796_v22 = vpop.f32.mrf.mxu1 }
 0x1b5   : > { %v797_v24 = vadd.f32 %v2215_v28, %v796_v22 }
 0x1b6   : > { %v972_v25 = vpop.f32.mrf.mxu2 }
 0x1b7   : > { %v848_v27 = vmax.f32 %v797_v24, 0.0  ;;  %v973_v29 = vadd.f32 %v2281_v20, %v972_v25 }
 0x1b9   : > { %v870_v31 = vpack.c.bf16 %v848_v27, %v847_v26  ;;  %v1051_v32 = vmax.f32 %v973_v29, 0.0 }
 0x1bb   : > { %1834 = vmatmul.msk.bf16.gmra.mxu2 %vm691_vm1, %v870_v31  ;;  %v1082_v33 = vpack.c.bf16 %v1051_v32, %v1050_v30 }
 0x1bc   : > { %v799_v34 = vpop.f32.mrf.mxu1 }
 0x1bd   : > { %1857 = vmatmul.msk.bf16.vlgmr.msra.gmra.mxu3 %vm691_vm1, %v1082_v33  ;;  %v800_v36 = vadd.f32 %v2215_v28, %v799_v34 }
 0x1be   : > { %v975_v35 = vpop.f32.mrf.mxu2 }
 0x1bf   : > { %v976_v38 = vadd.f32 %v2281_v20, %v975_v35  ;;  %v849_v41 = vmax.f32 %v800_v36, 0.0 }
 0x1c1   : > { %v1052_v44 = vmax.f32 %v976_v38, 0.0 }
 0x1c4   : > { %v801_v37 = vpop.f32.mrf.mxu1 }
 0x1c5   : > { %v802_v39 = vadd.f32 %v2215_v28, %v801_v37 }
 0x1c6   : > { %v977_v40 = vpop.f32.mrf.mxu2 }
 0x1c7   : > { %v850_v42 = vmax.f32 %v802_v39, 0.0  ;;  %v978_v43 = vadd.f32 %v2281_v20, %v977_v40 }
 0x1c9   : > { %v871_v45 = vpack.c.bf16 %v850_v42, %v849_v41  ;;  %v1053_v46 = vmax.f32 %v978_v43, 0.0 }
 0x1cb   : > { %1835 = vmatmul.msk.bf16.gmra.mxu2 %vm691_vm1, %v871_v45  ;;  %v1083_v47 = vpack.c.bf16 %v1053_v46, %v1052_v44 }
 0x1cc   : > { %v804_v48 = vpop.f32.mrf.mxu1 }
 0x1cd   : > { %1858 = vmatmul.msk.bf16.gmra.mxu3 %vm691_vm1, %v1083_v47  ;;  %v805_v50 = vadd.f32 %v2215_v28, %v804_v48 }
 0x1ce   : > { %v980_v49 = vpop.f32.mrf.mxu2 }
 0x1cf   : > { %v981_v52 = vadd.f32 %v2281_v20, %v980_v49  ;;  %v851_v55 = vmax.f32 %v805_v50, 0.0 }
 0x1d1   : > { %v1054_v58 = vmax.f32 %v981_v52, 0.0 }
 0x1d4   : > { %v806_v51 = vpop.f32.mrf.mxu1 }
 0x1d5   : > { %v807_v53 = vadd.f32 %v2215_v28, %v806_v51 }
 0x1d6   : > { %v982_v54 = vpop.f32.mrf.mxu2 }
 0x1d7   : > { %v852_v56 = vmax.f32 %v807_v53, 0.0  ;;  %v983_v57 = vadd.f32 %v2281_v20, %v982_v54 }
 0x1d9   : > { %v872_v59 = vpack.c.bf16 %v852_v56, %v851_v55  ;;  %v1055_v60 = vmax.f32 %v983_v57, 0.0 }
 0x1db   : > { %1836 = vmatmul.msk.bf16.gmra.mxu2 %vm691_vm1, %v872_v59  ;;  %v1084_v61 = vpack.c.bf16 %v1055_v60, %v1054_v58 }
 0x1dc   : > { %v809_v62 = vpop.f32.mrf.mxu1 }
 0x1dd   : > { %1859 = vmatmul.msk.bf16.gmra.mxu3 %vm691_vm1, %v1084_v61  ;;  %v810_v0 = vadd.f32 %v2215_v28, %v809_v62 }
 0x1de   : > { %v985_v63 = vpop.f32.mrf.mxu2 }
 0x1df   : > { %v986_v2 = vadd.f32 %v2281_v20, %v985_v63  ;;  %v853_v4 = vmax.f32 %v810_v0, 0.0 }
 0x1e1   : > { %v1056_v7 = vmax.f32 %v986_v2, 0.0 }
 0x1e4   : > { %v811_v1 = vpop.f32.mrf.mxu1 }
 0x1e5   : > { %v812_v16 = vadd.f32 %v2215_v28, %v811_v1 }
 0x1e6   : > { %v987_v3 = vpop.f32.mrf.mxu2 }
 0x1e7   : > { %v854_v5 = vmax.f32 %v812_v16, 0.0  ;;  %v988_v6 = vadd.f32 %v2281_v20, %v987_v3 }
 0x1e9   : > { %v873_v8 = vpack.c.bf16 %v854_v5, %v853_v4  ;;  %v1057_v9 = vmax.f32 %v988_v6, 0.0  ;;  %v2334_v4 = vld [vmem:[%s2726_s8] ss:$0 sm:$0xff] }
 0x1eb   : > { %1837 = vmatmul.msk.bf16.gmra.mxu2 %vm691_vm1, %v873_v8  ;;  %v1085_v10 = vpack.c.bf16 %v1057_v9, %v1056_v7 }
 0x1ec   : > { %v814_v11 = vpop.f32.mrf.mxu1 }
 0x1ed   : > { %1860 = vmatmul.msk.bf16.gmra.mxu3 %vm691_vm1, %v1085_v10  ;;  %v815_v13 = vadd.f32 %v2215_v28, %v814_v11 }
 0x1ee   : > { %v990_v12 = vpop.f32.mrf.mxu2 }
 0x1ef   : > { %v991_v15 = vadd.f32 %v2281_v20, %v990_v12  ;;  %v855_v19 = vmax.f32 %v815_v13, 0.0 }
 0x1f1   : > { %v1058_v23 = vmax.f32 %v991_v15, 0.0 }
 0x1f4   : > { %v816_v14 = vpop.f32.mrf.mxu1 }
 0x1f5   : > { %v817_v17 = vadd.f32 %v2215_v28, %v816_v14 }
 0x1f6   : > { %v992_v18 = vpop.f32.mrf.mxu2 }
 0x1f7   : > { %v856_v21 = vmax.f32 %v817_v17, 0.0  ;;  %v993_v22 = vadd.f32 %v2281_v20, %v992_v18 }
 0x1f9   : > { %v874_v24 = vpack.c.bf16 %v856_v21, %v855_v19  ;;  %v1059_v25 = vmax.f32 %v993_v22, 0.0 }
 0x1fb   : > { %v1086_v26 = vpack.c.bf16 %v1059_v25, %v1058_v23  ;;  %1838 = vmatmul.msk.bf16.gmra.mxu2 %vm691_vm1, %v874_v24 }
 0x1fc   : > { %v819_v27 = vpop.f32.mrf.mxu1 }
 0x1fd   : > { %1861 = vmatmul.msk.bf16.gmra.mxu3 %vm691_vm1, %v1086_v26  ;;  %v820_v30 = vadd.f32 %v2215_v28, %v819_v27 }
 0x1fe   : > { %v995_v29 = vpop.f32.mrf.mxu2 }
 0x1ff   : > { %v996_v32 = vadd.f32 %v2281_v20, %v995_v29  ;;  %v857_v35 = vmax.f32 %v820_v30, 0.0 }
 0x201   : > { %v1060_v38 = vmax.f32 %v996_v32, 0.0 }
 0x204   : > { %v821_v31 = vpop.f32.mrf.mxu1 }
 0x205   : > { %v822_v33 = vadd.f32 %v2215_v28, %v821_v31 }
 0x206   : > { %v997_v34 = vpop.f32.mrf.mxu2 }
 0x207   : > { %v858_v36 = vmax.f32 %v822_v33, 0.0  ;;  %v998_v37 = vadd.f32 %v2281_v20, %v997_v34 }
 0x209   : > { %v875_v39 = vpack.c.bf16 %v858_v36, %v857_v35  ;;  %v1061_v40 = vmax.f32 %v998_v37, 0.0 }
 0x20b   : > { %v1087_v41 = vpack.c.bf16 %v1061_v40, %v1060_v38  ;;  %1839 = vmatmul.msk.bf16.gmra.mxu2 %vm691_vm1, %v875_v39 }
 0x20c   : > { %v824_v42 = vpop.f32.mrf.mxu1 }
 0x20d   : > { %1862 = vmatmul.msk.bf16.gmra.mxu3 %vm691_vm1, %v1087_v41  ;;  %v825_v44 = vadd.f32 %v2215_v28, %v824_v42 }
 0x20e   : > { %v1000_v43 = vpop.f32.mrf.mxu2 }
 0x20f   : > { %v1001_v46 = vadd.f32 %v2281_v20, %v1000_v43  ;;  %v859_v49 = vmax.f32 %v825_v44, 0.0 }
 0x211   : > { %v1062_v52 = vmax.f32 %v1001_v46, 0.0 }
 0x214   : > { %v826_v45 = vpop.f32.mrf.mxu1 }
 0x215   : > { %v827_v47 = vadd.f32 %v2215_v28, %v826_v45 }
 0x216   : > { %v1002_v48 = vpop.f32.mrf.mxu2 }
 0x217   : > { %v860_v50 = vmax.f32 %v827_v47, 0.0  ;;  %v1003_v51 = vadd.f32 %v2281_v20, %v1002_v48 }
 0x219   : > { %v876_v53 = vpack.c.bf16 %v860_v50, %v859_v49  ;;  %v1063_v54 = vmax.f32 %v1003_v51, 0.0 }
 0x21b   : > { %v1088_v55 = vpack.c.bf16 %v1063_v54, %v1062_v52  ;;  %1840 = vmatmul.msk.bf16.gmra.mxu2 %vm691_vm1, %v876_v53 }
 0x21d   : > { %1863 = vmatmul.msk.bf16.gmra.mxu3 %vm691_vm1, %v1088_v55 }
 0x21e   : > { %v1005_v56 = vpop.f32.mrf.mxu2 }
 0x21f   : > { %v1006_v57 = vadd.f32 %v2281_v20, %v1005_v56 }
 0x221   : > { %v1064_v28 = vmax.f32 %v1006_v57, 0.0 }
 0x226   : > { %v1007_v58 = vpop.f32.mrf.mxu2 }
 0x227   : > { %v1008_v59 = vadd.f32 %v2281_v20, %v1007_v58 }
 0x229   : > { %v1065_v60 = vmax.f32 %v1008_v59, 0.0 }
 0x22b   : > { %v1089_v61 = vpack.c.bf16 %v1065_v60, %v1064_v28 }
 0x22d   : > { %1864 = vmatmul.msk.bf16.gmra.mxu3 %vm691_vm1, %v1089_v61 }
 0x22e   : > { %v1010_v62 = vpop.f32.mrf.mxu2 }
 0x22f   : > { %v1011_v63 = vadd.f32 %v2281_v20, %v1010_v62 }
 0x231   : > { %v1066_v2 = vmax.f32 %v1011_v63, 0.0 }
 0x236   : > { %v1012_v0 = vpop.f32.mrf.mxu2 }
 0x237   : > { %v1013_v1 = vadd.f32 %v2281_v20, %v1012_v0 }
 0x239   : > { %v1067_v16 = vmax.f32 %v1013_v1, 0.0 }
 0x23b   : > { %v1090_v3 = vpack.c.bf16 %v1067_v16, %v1066_v2 }
 0x23d   : > { %1865 = vmatmul.msk.bf16.gmra.mxu3 %vm691_vm1, %v1090_v3 }
 0x23e   : > { %v1015_v5 = vpop.f32.mrf.mxu2 }
 0x23f   : > { %v1016_v8 = vadd.f32 %v2281_v20, %v1015_v5 }
 0x240   : > { %v1191_v6 = vpop.f32.mrf.mxu3 }
 0x241   : > { %v2337_v7 = vadd.f32 %v2334_v4, %v1191_v6  ;;  %v1068_v12 = vmax.f32 %v1016_v8, 0.0 }
 0x243   : > { %1271 = vmax.xlane.f32.xlu0 %v2337_v7 }
 0x246   : > { %v1017_v9 = vpop.f32.mrf.mxu2 }
 0x247   : > { %v1018_v10 = vadd.f32 %v2281_v20, %v1017_v9 }
 0x248   : > { %v1193_v11 = vpop.f32.mrf.mxu3 }
 0x249   : > { %v1069_v13 = vmax.f32 %v1018_v10, 0.0  ;;  %v2343_v14 = vadd.f32 %v2334_v4, %v1193_v11 }
 0x24b   : > { %v1091_v15 = vpack.c.bf16 %v1069_v13, %v1068_v12  ;;  %1273 = vmax.xlane.f32.xlu0 %v2343_v14 }
 0x24d   : > { %1866 = vmatmul.msk.bf16.gmra.mxu3 %vm691_vm1, %v1091_v15 }
 0x24e   : > { %v1020_v17 = vpop.f32.mrf.mxu2 }
 0x24f   : > { %v1021_v21 = vadd.f32 %v2281_v20, %v1020_v17 }
 0x250   : > { %v1196_v18 = vpop.f32.mrf.mxu3 }
 0x251   : > { %v2348_v19 = vadd.f32 %v2334_v4, %v1196_v18  ;;  %v1070_v25 = vmax.f32 %v1021_v21, 0.0 }
 0x253   : > { %1275 = vmax.xlane.f32.xlu1 %v2348_v19 }
 0x256   : > { %v1022_v22 = vpop.f32.mrf.mxu2 }
 0x257   : > { %v1023_v23 = vadd.f32 %v2281_v20, %v1022_v22 }
 0x258   : > { %v1198_v24 = vpop.f32.mrf.mxu3 }
 0x259   : > { %v1071_v26 = vmax.f32 %v1023_v23, 0.0  ;;  %v2354_v27 = vadd.f32 %v2334_v4, %v1198_v24 }
 0x25b   : > { %v1092_v29 = vpack.c.bf16 %v1071_v26, %v1070_v25  ;;  %1277 = vmax.xlane.f32.xlu1 %v2354_v27 }
 0x25d   : > { %1867 = vmatmul.msk.bf16.gmra.mxu3 %vm691_vm1, %v1092_v29 }
 0x25e   : > { %v1025_v30 = vpop.f32.mrf.mxu2 }
 0x25f   : > { %v1026_v33 = vadd.f32 %v2281_v20, %v1025_v30 }
 0x260   : > { %v1201_v31 = vpop.f32.mrf.mxu3 }
 0x261   : > { %v2359_v32 = vadd.f32 %v2334_v4, %v1201_v31  ;;  %v1072_v37 = vmax.f32 %v1026_v33, 0.0 }
 0x263   : > { %1279 = vmax.xlane.f32.xlu2 %v2359_v32 }
 0x266   : > { %v1027_v34 = vpop.f32.mrf.mxu2 }
 0x267   : > { %v1028_v35 = vadd.f32 %v2281_v20, %v1027_v34 }
 0x268   : > { %v1203_v36 = vpop.f32.mrf.mxu3 }
 0x269   : > { %v1073_v38 = vmax.f32 %v1028_v35, 0.0  ;;  %v2365_v39 = vadd.f32 %v2334_v4, %v1203_v36 }
 0x26b   : > { %v1093_v40 = vpack.c.bf16 %v1073_v38, %v1072_v37  ;;  %1281 = vmax.xlane.f32.xlu2 %v2365_v39 }
 0x26d   : > { %1868 = vmatmul.msk.bf16.gmra.mxu3 %vm691_vm1, %v1093_v40 }
 0x26e   : > { %v1030_v41 = vpop.f32.mrf.mxu2 }
 0x26f   : > { %v1031_v44 = vadd.f32 %v2281_v20, %v1030_v41 }
 0x270   : > { %v1206_v42 = vpop.f32.mrf.mxu3 }
 0x271   : > { %v2370_v43 = vadd.f32 %v2334_v4, %v1206_v42  ;;  %v1074_v48 = vmax.f32 %v1031_v44, 0.0 }
 0x273   : > { %1283 = vmax.xlane.f32.xlu0 %v2370_v43 }
 0x276   : > { %v1032_v45 = vpop.f32.mrf.mxu2 }
 0x277   : > { %v1033_v46 = vadd.f32 %v2281_v20, %v1032_v45 }
 0x278   : > { %v1208_v47 = vpop.f32.mrf.mxu3 }
 0x279   : > { %v1075_v49 = vmax.f32 %v1033_v46, 0.0  ;;  %v2376_v50 = vadd.f32 %v2334_v4, %v1208_v47 }
 0x27b   : > { %v1094_v51 = vpack.c.bf16 %v1075_v49, %v1074_v48  ;;  %1285 = vmax.xlane.f32.xlu1 %v2376_v50 }
 0x27d   : > { %1869 = vmatmul.msk.bf16.gmra.mxu3 %vm691_vm1, %v1094_v51 }
 0x27e   : > { %v1035_v52 = vpop.f32.mrf.mxu2 }
 0x27f   : > { %v1036_v55 = vadd.f32 %v2281_v20, %v1035_v52 }
 0x280   : > { %v1211_v53 = vpop.f32.mrf.mxu3 }
 0x281   : > { %v2381_v54 = vadd.f32 %v2334_v4, %v1211_v53  ;;  %v1076_v59 = vmax.f32 %v1036_v55, 0.0 }
 0x283   : > { %1287 = vmax.xlane.f32.xlu2 %v2381_v54 }
 0x286   : > { %v1037_v56 = vpop.f32.mrf.mxu2 }
 0x287   : > { %v1038_v57 = vadd.f32 %v2281_v20, %v1037_v56 }
 0x288   : > { %v1213_v58 = vpop.f32.mrf.mxu3 }
 0x289   : > { %v1077_v28 = vmax.f32 %v1038_v57, 0.0  ;;  %v2387_v60 = vadd.f32 %v2334_v4, %v1213_v58 }
 0x28b   : > { %v1095_v61 = vpack.c.bf16 %v1077_v28, %v1076_v59  ;;  %1289 = vmax.xlane.f32.xlu0 %v2387_v60 }
 0x28d   : > { %1870 = vmatmul.msk.bf16.gmra.mxu3 %vm691_vm1, %v1095_v61 }
 0x28e   : > { %v1040_v62 = vpop.f32.mrf.mxu2 }
 0x28f   : > { %v1041_v1 = vadd.f32 %v2281_v20, %v1040_v62 }
 0x290   : > { %v1216_v63 = vpop.f32.mrf.mxu3 }
 0x291   : > { %v2392_v0 = vadd.f32 %v2334_v4, %v1216_v63  ;;  %v1078_v5 = vmax.f32 %v1041_v1, 0.0 }
 0x293   : > { %1291 = vmax.xlane.f32.xlu1 %v2392_v0 }
 0x296   : > { %v1042_v2 = vpop.f32.mrf.mxu2 }
 0x297   : > { %v1043_v16 = vadd.f32 %v2281_v20, %v1042_v2 }
 0x298   : > { %v1218_v3 = vpop.f32.mrf.mxu3 }
 0x299   : > { %v1079_v6 = vmax.f32 %v1043_v16, 0.0  ;;  %v2398_v8 = vadd.f32 %v2334_v4, %v1218_v3 }
 0x29b   : > { %v1096_v9 = vpack.c.bf16 %v1079_v6, %v1078_v5  ;;  %1293 = vmax.xlane.f32.xlu2 %v2398_v8 }
 0x29d   : > { %1871 = vmatmul.msk.bf16.gmra.mxu3 %vm691_vm1, %v1096_v9 }
 0x29e   : > { %v1045_v10 = vpop.f32.mrf.mxu2 }
 0x29f   : > { %v1046_v13 = vadd.f32 %v2281_v20, %v1045_v10 }
 0x2a0   : > { %v1221_v11 = vpop.f32.mrf.mxu3 }
 0x2a1   : > { %v2403_v12 = vadd.f32 %v2334_v4, %v1221_v11  ;;  %v1080_v21 = vmax.f32 %v1046_v13, 0.0 }
 0x2a3   : > { %1295 = vmax.xlane.f32.xlu0 %v2403_v12 }
 0x2a6   : > { %v1047_v15 = vpop.f32.mrf.mxu2 }
 0x2a7   : > { %v1048_v17 = vadd.f32 %v2281_v20, %v1047_v15 }
 0x2a8   : > { %v1223_v18 = vpop.f32.mrf.mxu3 }
 0x2a9   : > { %v1081_v22 = vmax.f32 %v1048_v17, 0.0  ;;  %v2409_v23 = vadd.f32 %v2334_v4, %v1223_v18 }
 0x2ab   : > { %v1097_v24 = vpack.c.bf16 %v1081_v22, %v1080_v21  ;;  %1297 = vmax.xlane.f32.xlu1 %v2409_v23 }
 0x2ad   : > { %1872 = vmatmul.msk.bf16.gmra.mxu3 %vm691_vm1, %v1097_v24 }
 0x2b0   : > { %v1226_v25 = vpop.f32.mrf.mxu3 }
 0x2b1   : > { %v2414_v26 = vadd.f32 %v2334_v4, %v1226_v25 }
 0x2b3   : > { %1299 = vmax.xlane.f32.xlu2 %v2414_v26 }
 0x2b6   : > { %v1272_v29 = vpop.xlane.xlu0 %1271 }
 0x2b7   : > { %v2418_v20 = vsub.f32 %v2337_v7, %v1272_v29 }
 0x2b8   : > { %v1228_v30 = vpop.f32.mrf.mxu3 }
 0x2b9   : > { %v1367_v31 = vmul.f32 1.442695, %v2418_v20  ;;  %v2422_v33 = vadd.f32 %v2334_v4, %v1228_v30 }
 0x2bb   : > { %1917 = vpow2.f32 %v1367_v31  ;;  %1301 = vmax.xlane.f32.xlu0 %v2422_v33 }
 0x2be   : > { %v1274_v34 = vpop.xlane.xlu0 %1273 }
 0x2bf   : > { %v2426_v35 = vsub.f32 %v2343_v14, %v1274_v34 }
 0x2c0   : > { %v1231_v36 = vpop.f32.mrf.mxu3 }
 0x2c1   : > { %v1918_v37 = vpop.eup %1917  ;;  %v1369_v38 = vmul.f32 1.442695, %v2426_v35  ;;  %v2430_v7 = vadd.f32 %v2334_v4, %v1231_v36 }
 0x2c2   : > { %1431 = vadd.xlane.f32.xlu2 %v1918_v37 }
 0x2c3   : > { %1919 = vpow2.f32 %v1369_v38  ;;  %1303 = vmax.xlane.f32.xlu1 %v2430_v7 }
 0x2c6   : > { %v1276_v40 = vpop.xlane.xlu1 %1275 }
 0x2c7   : > { %v2434_v41 = vsub.f32 %v2348_v19, %v1276_v40 }
 0x2c8   : > { %v1233_v42 = vpop.f32.mrf.mxu3 }
 0x2c9   : > { %v1920_v44 = vpop.eup %1919  ;;  %v1371_v14 = vmul.f32 1.442695, %v2434_v41  ;;  %v2438_v45 = vadd.f32 %v2334_v4, %v1233_v42 }
 0x2ca   : > { %1433 = vadd.xlane.f32.xlu0 %v1920_v44 }
 0x2cb   : > { %1921 = vpow2.f32 %v1371_v14  ;;  %1305 = vmax.xlane.f32.xlu2 %v2438_v45 }
 0x2ce   : > { %v1278_v46 = vpop.xlane.xlu1 %1277 }
 0x2cf   : > { %v2442_v47 = vsub.f32 %v2354_v27, %v1278_v46 }
 0x2d0   : > { %v1236_v48 = vpop.f32.mrf.mxu3 }
 0x2d1   : > { %v1922_v49 = vpop.eup %1921  ;;  %v1373_v19 = vmul.f32 1.442695, %v2442_v47  ;;  %v2446_v51 = vadd.f32 %v2334_v4, %v1236_v48 }
 0x2d2   : > { %1435 = vadd.xlane.f32.xlu1 %v1922_v49 }
 0x2d3   : > { %1923 = vpow2.f32 %v1373_v19  ;;  %1307 = vmax.xlane.f32.xlu0 %v2446_v51 }
 0x2d6   : > { %v1280_v52 = vpop.xlane.xlu2 %1279 }
 0x2d7   : > { %v2450_v53 = vsub.f32 %v2359_v32, %v1280_v52 }
 0x2d8   : > { %v1238_v55 = vpop.f32.mrf.mxu3 }
 0x2d9   : > { %v1924_v56 = vpop.eup %1923  ;;  %v1375_v27 = vmul.f32 1.442695, %v2450_v53  ;;  %v2454_v57 = vadd.f32 %v2334_v4, %v1238_v55 }
 0x2da   : > { %1437 = vadd.xlane.f32.xlu2 %v1924_v56 }
 0x2db   : > { %1925 = vpow2.f32 %v1375_v27  ;;  %1309 = vmax.xlane.f32.xlu1 %v2454_v57 }
 0x2de   : > { %v1282_v58 = vpop.xlane.xlu2 %1281 }
 0x2df   : > { %v2458_v59 = vsub.f32 %v2365_v39, %v1282_v58 }
 0x2e0   : > { %v1241_v28 = vpop.f32.mrf.mxu3 }
 0x2e1   : > { %v1926_v61 = vpop.eup %1925  ;;  %v1377_v32 = vmul.f32 1.442695, %v2458_v59  ;;  %v2462_v62 = vadd.f32 %v2334_v4, %v1241_v28 }
 0x2e2   : > { %1439 = vadd.xlane.f32.xlu0 %v1926_v61 }
 0x2e3   : > { %1927 = vpow2.f32 %v1377_v32  ;;  %1311 = vmax.xlane.f32.xlu2 %v2462_v62 }
 0x2e6   : > { %v1284_v63 = vpop.xlane.xlu0 %1283 }
 0x2e7   : > { %v2466_v1 = vsub.f32 %v2370_v43, %v1284_v63 }
 0x2e8   : > { %v1243_v2 = vpop.f32.mrf.mxu3 }
 0x2e9   : > { %v1928_v16 = vpop.eup %1927  ;;  %v1379_v39 = vmul.f32 1.442695, %v2466_v1  ;;  %v2470_v3 = vadd.f32 %v2334_v4, %v1243_v2 }
 0x2ea   : > { %1441 = vadd.xlane.f32.xlu1 %v1928_v16 }
 0x2eb   : > { %1929 = vpow2.f32 %v1379_v39  ;;  %1313 = vmax.xlane.f32.xlu0 %v2470_v3 }
 0x2ee   : > { %v1286_v5 = vpop.xlane.xlu1 %1285 }
 0x2ef   : > { %v2474_v6 = vsub.f32 %v2376_v50, %v1286_v5 }
 0x2f0   : > { %v1246_v9 = vpop.f32.mrf.mxu3 }
 0x2f1   : > { %v1930_v10 = vpop.eup %1929  ;;  %v1381_v43 = vmul.f32 1.442695, %v2474_v6  ;;  %v2478_v11 = vadd.f32 %v2334_v4, %v1246_v9 }
 0x2f2   : > { %1443 = vadd.xlane.f32.xlu2 %v1930_v10 }
 0x2f3   : > { %1931 = vpow2.f32 %v1381_v43  ;;  %1315 = vmax.xlane.f32.xlu1 %v2478_v11 }
 0x2f6   : > { %v1288_v13 = vpop.xlane.xlu2 %1287 }
 0x2f7   : > { %v2482_v15 = vsub.f32 %v2381_v54, %v1288_v13 }
 0x2f8   : > { %v1248_v17 = vpop.f32.mrf.mxu3 }
 0x2f9   : > { %v1932_v18 = vpop.eup %1931  ;;  %v1383_v50 = vmul.f32 1.442695, %v2482_v15  ;;  %v2486_v21 = vadd.f32 %v2334_v4, %v1248_v17 }
 0x2fa   : > { %1445 = vadd.xlane.f32.xlu0 %v1932_v18 }
 0x2fb   : > { %1933 = vpow2.f32 %v1383_v50  ;;  %1317 = vmax.xlane.f32.xlu2 %v2486_v21 }
 0x2fe   : > { %v1290_v22 = vpop.xlane.xlu0 %1289 }
 0x2ff   : > { %v2490_v24 = vsub.f32 %v2387_v60, %v1290_v22 }
 0x300   : > { %v1251_v25 = vpop.f32.mrf.mxu3 }
 0x301   : > { %v1934_v29 = vpop.eup %1933  ;;  %v1385_v54 = vmul.f32 1.442695, %v2490_v24  ;;  %v2494_v30 = vadd.f32 %v2334_v4, %v1251_v25 }
 0x302   : > { %1447 = vadd.xlane.f32.xlu1 %v1934_v29 }
 0x303   : > { %1935 = vpow2.f32 %v1385_v54  ;;  %1319 = vmax.xlane.f32.xlu0 %v2494_v30 }
 0x306   : > { %v1292_v31 = vpop.xlane.xlu1 %1291 }
 0x307   : > { %v2498_v34 = vsub.f32 %v2392_v0, %v1292_v31 }
 0x308   : > { %v1253_v36 = vpop.f32.mrf.mxu3 }
 0x309   : > { %v1936_v37 = vpop.eup %1935  ;;  %v1387_v60 = vmul.f32 1.442695, %v2498_v34  ;;  %v2502_v38 = vadd.f32 %v2334_v4, %v1253_v36 }
 0x30a   : > { %1449 = vadd.xlane.f32.xlu2 %v1936_v37 }
 0x30b   : > { %1937 = vpow2.f32 %v1387_v60  ;;  %1321 = vmax.xlane.f32.xlu1 %v2502_v38 }
 0x30e   : > { %v1294_v52 = vpop.xlane.xlu2 %1293 }
 0x310   : > { %v1256_v40 = vpop.f32.mrf.mxu3 }
 0x311   : > { %v1938_v42 = vpop.eup %1937  ;;  %v2506_v44 = vadd.f32 %v2334_v4, %v1256_v40 }
 0x312   : > { %1451 = vadd.xlane.f32.xlu0 %v1938_v42 }
 0x313   : > { %1323 = vmax.xlane.f32.xlu2 %v2506_v44 }
 0x316   : > { %v1296_v48 = vpop.xlane.xlu0 %1295 }
 0x317   : > { %v2518_v19 = vsub.f32 %v2403_v12, %v1296_v48 }
 0x318   : > { %v1258_v0 = vpop.f32.mrf.mxu3 }
 0x319   : > { %v2510_v14 = vadd.f32 %v2334_v4, %v1258_v0  ;;  %v1391_v55 = vmul.f32 1.442695, %v2518_v19 }
 0x31b   : > { %1325 = vmax.xlane.f32.xlu0 %v2510_v14  ;;  %1939 = vpow2.f32 %v1391_v55 }
 0x31e   : > { %v1298_v27 = vpop.xlane.xlu1 %1297 }
 0x31f   : > { %v2526_v28 = vsub.f32 %v2409_v23, %v1298_v27  ;;  %v2538_v23 = vsub.f32 %v2398_v8, %v1294_v52 }
 0x320   : > { %v1261_v46 = vpop.f32.mrf.mxu3 }
 0x321   : > { %v2514_v49 = vadd.f32 %v2334_v4, %v1261_v46  ;;  %v1393_v12 = vmul.f32 1.442695, %v2526_v28  ;;  %v1940_v5 = vpop.eup %1939  ;;  %v1389_v43 = vmul.f32 1.442695, %v2538_v23 }
 0x323   : > { %1327 = vmax.xlane.f32.xlu1 %v2514_v49 }
 0x326   : > { %v1300_v61 = vpop.xlane.xlu2 %1299 }
 0x328   : > { %v1263_v56 = vpop.f32.mrf.mxu3 }
 0x329   : > { %v2522_v58 = vadd.f32 %v2334_v4, %v1263_v56 }
 0x32b   : > { %1329 = vmax.xlane.f32.xlu2 %v2522_v58 }
 0x32e   : > { %v1302_v32 = vpop.xlane.xlu0 %1301 }
 0x32f   : > { %v2529_v63 = vsub.f32 %v2422_v33, %v1302_v32 }
 0x330   : > { %v1266_v2 = vpop.f32.mrf.mxu3 }
 0x331   : > { %v1397_v16 = vmul.f32 1.442695, %v2529_v63  ;;  %v2534_v39 = vadd.f32 %v2334_v4, %v1266_v2 }
 0x333   : > { %1941 = vpow2.f32 %v1397_v16  ;;  %1331 = vmax.xlane.f32.xlu0 %v2534_v39  ;;  %1455 = vadd.xlane.f32.xlu2 %v1940_v5 }
 0x334   : > { %1943 = vpow2.f32 %v1393_v12 }
 0x335   : > { %v1432_v33 = vpop.xlane.xlu2 %1431 }
 0x336   : > { %1945 = vlog2.f32 %v1432_v33  ;;  %v1304_v9 = vpop.xlane.xlu1 %1303 }
 0x337   : > { %v2541_v10 = vsub.f32 %v2430_v7, %v1304_v9  ;;  %v2551_v7 = vsub.f32 %v2414_v26, %v1300_v61 }
 0x338   : > { %v1268_v13 = vpop.f32.mrf.mxu3 }
 0x339   : > { %v1942_v17 = vpop.eup %1941  ;;  %v1399_v18 = vmul.f32 1.442695, %v2541_v10  ;;  %v2546_v50 = vadd.f32 %v2334_v4, %v1268_v13  ;;  %v1395_v54 = vmul.f32 1.442695, %v2551_v7 }
 0x33a   : > { %v1944_v22 = vpop.eup %1943 }
 0x33b   : > { %1947 = vpow2.f32 %v1399_v18  ;;  %1333 = vmax.xlane.f32.xlu1 %v2546_v50  ;;  %1457 = vadd.xlane.f32.xlu0 %v1944_v22 }
 0x33c   : > { %v1946_v8 = vpop.eup %1945  ;;  %1949 = vpow2.f32 %v1389_v43  ;;  %1461 = vadd.xlane.f32.xlu2 %v1942_v17 }
 0x33d   : > { %v1496_v25 = vmul.f32 0.6931472, %v1946_v8  ;;  %v1434_v29 = vpop.xlane.xlu0 %1433 }
 0x33e   : > { %1951 = vlog2.f32 %v1434_v29  ;;  %v1306_v26 = vpop.xlane.xlu2 %1305 }
 0x33f   : > { %v1559_v4 = vsub.f32 %v2418_v20, %v1496_v25  ;;  %1953 = vpow2.f32 %v1395_v54  ;;  %v2563_v60 = vsub.f32 %v2438_v45, %v1306_v26 }
 0x341   : > { %v1948_v31 = vpop.eup %1947  ;;  %1592 = vst.msk [vmem:[%s2556_s17] sm:$0xff] %vm1591_vm2, %v1559_v4  ;;  %v1401_v48 = vmul.f32 1.442695, %v2563_v60 }
 0x342   : > { %v1950_v36 = vpop.eup %1949 }
 0x343   : > { %1453 = vadd.xlane.f32.xlu1 %v1950_v36  ;;  %1463 = vadd.xlane.f32.xlu0 %v1948_v31 }
 0x344   : > { %v1952_v37 = vpop.eup %1951 }
 0x345   : > { %v1498_v40 = vmul.f32 0.6931472, %v1952_v37  ;;  %v1436_v42 = vpop.xlane.xlu1 %1435  ;;  %v1954_v55 = vpop.eup %1953 }
 0x346   : > { %1955 = vlog2.f32 %v1436_v42  ;;  %v1308_v0 = vpop.xlane.xlu0 %1307 }
 0x347   : > { %v1560_v20 = vsub.f32 %v2426_v35, %v1498_v40  ;;  %v2567_v46 = vsub.f32 %v2446_v51, %v1308_v0 }
 0x349   : > { %1593 = vst.msk [vmem:[%s2556_s17 + $0x8] sm:$0xff] %vm1591_vm2, %v1560_v20  ;;  %v1403_v52 = vmul.f32 1.442695, %v2567_v46 }
 0x34b   : > { %1957 = vpow2.f32 %v1403_v52  ;;  %1459 = vadd.xlane.f32.xlu1 %v1954_v55 }
 0x34c   : > { %v1956_v45 = vpop.eup %1955  ;;  %1959 = vpow2.f32 %v1401_v48 }
 0x34d   : > { %v1500_v56 = vmul.f32 0.6931472, %v1956_v45  ;;  %v1438_v27 = vpop.xlane.xlu2 %1437 }
 0x34e   : > { %1961 = vlog2.f32 %v1438_v27  ;;  %v1310_v61 = vpop.xlane.xlu1 %1309 }
 0x34f   : > { %v1561_v35 = vsub.f32 %v2434_v41, %v1500_v56  ;;  %v2575_v51 = vsub.f32 %v2454_v57, %v1310_v61 }
 0x351   : > { %v1958_v32 = vpop.eup %1957  ;;  %1594 = vst.msk [vmem:[%s2556_s17 + $0x10] sm:$0xff] %vm1591_vm2, %v1561_v35  ;;  %v1405_v12 = vmul.f32 1.442695, %v2575_v51 }
 0x352   : > { %v1960_v2 = vpop.eup %1959  ;;  %1467 = vadd.xlane.f32.xlu2 %v1958_v32 }
 0x353   : > { %1963 = vpow2.f32 %v1405_v12  ;;  %1465 = vadd.xlane.f32.xlu1 %v1960_v2 }
 0x354   : > { %v1962_v16 = vpop.eup %1961 }
 0x355   : > { %v1502_v5 = vmul.f32 0.6931472, %v1962_v16  ;;  %v1440_v33 = vpop.xlane.xlu0 %1439 }
 0x356   : > { %1965 = vlog2.f32 %v1440_v33  ;;  %v1312_v9 = vpop.xlane.xlu2 %1311 }
 0x357   : > { %v1562_v41 = vsub.f32 %v2442_v47, %v1502_v5  ;;  %v2582_v57 = vsub.f32 %v2462_v62, %v1312_v9 }
 0x359   : > { %v1964_v43 = vpop.eup %1963  ;;  %1595 = vst.msk [vmem:[%s2556_s17 + $0x18] sm:$0xff] %vm1591_vm2, %v1562_v41  ;;  %v1407_v13 = vmul.f32 1.442695, %v2582_v57 }
 0x35a   : > { %1469 = vadd.xlane.f32.xlu0 %v1964_v43 }
 0x35b   : > { %1967 = vpow2.f32 %v1407_v13 }
 0x35c   : > { %v1966_v17 = vpop.eup %1965 }
 0x35d   : > { %v1504_v18 = vmul.f32 0.6931472, %v1966_v17  ;;  %v1442_v22 = vpop.xlane.xlu1 %1441 }
 0x35e   : > { %1969 = vlog2.f32 %v1442_v22  ;;  %v1314_v8 = vpop.xlane.xlu0 %1313 }
 0x35f   : > { %v1563_v25 = vsub.f32 %v2450_v53, %v1504_v18  ;;  %v2589_v47 = vsub.f32 %v2470_v3, %v1314_v8 }
 0x361   : > { %v1968_v62 = vpop.eup %1967  ;;  %1596 = vst.msk [vmem:[%s2556_s17 + $0x20] sm:$0xff] %vm1591_vm2, %v1563_v25  ;;  %v1409_v29 = vmul.f32 1.442695, %v2589_v47 }
 0x362   : > { %1471 = vadd.xlane.f32.xlu1 %v1968_v62 }
 0x363   : > { %1971 = vpow2.f32 %v1409_v29 }
 0x364   : > { %v1970_v4 = vpop.eup %1969 }
 0x365   : > { %v1506_v54 = vmul.f32 0.6931472, %v1970_v4  ;;  %v1444_v31 = vpop.xlane.xlu2 %1443 }
 0x366   : > { %1973 = vlog2.f32 %v1444_v31  ;;  %v1316_v26 = vpop.xlane.xlu1 %1315 }
 0x367   : > { %v1564_v36 = vsub.f32 %v2458_v59, %v1506_v54  ;;  %v2596_v53 = vsub.f32 %v2478_v11, %v1316_v26 }
 0x369   : > { %v1972_v3 = vpop.eup %1971  ;;  %1597 = vst.msk [vmem:[%s2556_s17 + $0x28] sm:$0xff] %vm1591_vm2, %v1564_v36  ;;  %v1411_v37 = vmul.f32 1.442695, %v2596_v53 }
 0x36a   : > { %1473 = vadd.xlane.f32.xlu2 %v1972_v3 }
 0x36b   : > { %1975 = vpow2.f32 %v1411_v37 }
 0x36c   : > { %v1974_v40 = vpop.eup %1973 }
 0x36d   : > { %v1508_v42 = vmul.f32 0.6931472, %v1974_v40  ;;  %v1446_v0 = vpop.xlane.xlu0 %1445 }
 0x36e   : > { %1977 = vlog2.f32 %v1446_v0  ;;  %v1318_v20 = vpop.xlane.xlu2 %1317 }
 0x36f   : > { %v1565_v48 = vsub.f32 %v2466_v1, %v1508_v42  ;;  %v2603_v59 = vsub.f32 %v2486_v21, %v1318_v20 }
 0x371   : > { %v1976_v11 = vpop.eup %1975  ;;  %1598 = vst.msk [vmem:[%s2556_s17 + $0x30] sm:$0xff] %vm1591_vm2, %v1565_v48  ;;  %v1413_v52 = vmul.f32 1.442695, %v2603_v59 }
 0x372   : > { %1475 = vadd.xlane.f32.xlu0 %v1976_v11 }
 0x373   : > { %1979 = vpow2.f32 %v1413_v52 }
 0x374   : > { %v1978_v55 = vpop.eup %1977 }
 0x375   : > { %v1510_v45 = vmul.f32 0.6931472, %v1978_v55  ;;  %v1448_v56 = vpop.xlane.xlu1 %1447 }
 0x376   : > { %1981 = vlog2.f32 %v1448_v56  ;;  %v1320_v27 = vpop.xlane.xlu0 %1319 }
 0x377   : > { %v1566_v61 = vsub.f32 %v2474_v6, %v1510_v45  ;;  %v2610_v1 = vsub.f32 %v2494_v30, %v1320_v27 }
 0x379   : > { %v1980_v21 = vpop.eup %1979  ;;  %1599 = vst.msk [vmem:[%s2556_s17 + $0x38] sm:$0xff] %vm1591_vm2, %v1566_v61  ;;  %v1415_v35 = vmul.f32 1.442695, %v2610_v1 }
 0x37a   : > { %1477 = vadd.xlane.f32.xlu1 %v1980_v21 }
 0x37b   : > { %1983 = vpow2.f32 %v1415_v35 }
 0x37c   : > { %v1982_v32 = vpop.eup %1981 }
 0x37d   : > { %v1512_v12 = vmul.f32 0.6931472, %v1982_v32  ;;  %v1450_v2 = vpop.xlane.xlu2 %1449 }
 0x37e   : > { %1985 = vlog2.f32 %v1450_v2  ;;  %v1322_v16 = vpop.xlane.xlu1 %1321 }
 0x37f   : > { %v1567_v5 = vsub.f32 %v2482_v15, %v1512_v12  ;;  %v2617_v6 = vsub.f32 %v2502_v38, %v1322_v16 }
 0x381   : > { %v1984_v30 = vpop.eup %1983  ;;  %1600 = vst.msk [vmem:[%s2556_s17 + $0x40] sm:$0xff] %vm1591_vm2, %v1567_v5  ;;  %v1417_v33 = vmul.f32 1.442695, %v2617_v6 }
 0x382   : > { %1479 = vadd.xlane.f32.xlu2 %v1984_v30 }
 0x383   : > { %1987 = vpow2.f32 %v1417_v33 }
 0x384   : > { %v1986_v9 = vpop.eup %1985 }
 0x385   : > { %v1514_v41 = vmul.f32 0.6931472, %v1986_v9  ;;  %v1452_v43 = vpop.xlane.xlu0 %1451 }
 0x386   : > { %1989 = vlog2.f32 %v1452_v43  ;;  %v1324_v13 = vpop.xlane.xlu2 %1323 }
 0x387   : > { %v1568_v17 = vsub.f32 %v2490_v24, %v1514_v41  ;;  %v2624_v15 = vsub.f32 %v2506_v44, %v1324_v13 }
 0x389   : > { %v1988_v38 = vpop.eup %1987  ;;  %1601 = vst.msk [vmem:[%s2556_s17 + $0x48] sm:$0xff] %vm1591_vm2, %v1568_v17  ;;  %v1419_v18 = vmul.f32 1.442695, %v2624_v15 }
 0x38a   : > { %1481 = vadd.xlane.f32.xlu0 %v1988_v38 }
 0x38b   : > { %1991 = vpow2.f32 %v1419_v18 }
 0x38c   : > { %v1990_v22 = vpop.eup %1989 }
 0x38d   : > { %v1516_v8 = vmul.f32 0.6931472, %v1990_v22 }
 0x38e   : > { %v1326_v25 = vpop.xlane.xlu0 %1325 }
 0x38f   : > { %v1569_v62 = vsub.f32 %v2498_v34, %v1516_v8  ;;  %v2631_v29 = vsub.f32 %v2510_v14, %v1326_v25 }
 0x391   : > { %v1992_v4 = vpop.eup %1991  ;;  %1602 = vst.msk [vmem:[%s2556_s17 + $0x50] sm:$0xff] %vm1591_vm2, %v1569_v62  ;;  %v1421_v24 = vmul.f32 1.442695, %v2631_v29 }
 0x392   : > { %1483 = vadd.xlane.f32.xlu1 %v1992_v4 }
 0x393   : > { %1993 = vpow2.f32 %v1421_v24 }
 0x396   : > { %v1328_v44 = vpop.xlane.xlu1 %1327 }
 0x397   : > { %v2637_v54 = vsub.f32 %v2514_v49, %v1328_v44 }
 0x399   : > { %v1994_v31 = vpop.eup %1993  ;;  %v1423_v26 = vmul.f32 1.442695, %v2637_v54 }
 0x39a   : > { %1485 = vadd.xlane.f32.xlu2 %v1994_v31 }
 0x39b   : > { %1995 = vpow2.f32 %v1423_v26 }
 0x39e   : > { %v1330_v34 = vpop.xlane.xlu2 %1329 }
 0x39f   : > { %v2641_v14 = vsub.f32 %v2522_v58, %v1330_v34 }
 0x3a1   : > { %v1996_v36 = vpop.eup %1995  ;;  %v1425_v3 = vmul.f32 1.442695, %v2641_v14 }
 0x3a2   : > { %1487 = vadd.xlane.f32.xlu0 %v1996_v36 }
 0x3a3   : > { %1997 = vpow2.f32 %v1425_v3 }
 0x3a6   : > { %v1456_v37 = vpop.xlane.xlu2 %1455  ;;  %v1332_v40 = vpop.xlane.xlu0 %1331 }
 0x3a7   : > { %1999 = vlog2.f32 %v1456_v37  ;;  %v2645_v49 = vsub.f32 %v2534_v39, %v1332_v40 }
 0x3a9   : > { %v1998_v42 = vpop.eup %1997  ;;  %v1427_v0 = vmul.f32 1.442695, %v2645_v49 }
 0x3aa   : > { %1489 = vadd.xlane.f32.xlu1 %v1998_v42 }
 0x3ab   : > { %2001 = vpow2.f32 %v1427_v0 }
 0x3ad   : > { %v2000_v20 = vpop.eup %1999 }
 0x3ae   : > { %v1520_v58 = vmul.f32 0.6931472, %v2000_v20  ;;  %v1334_v48 = vpop.xlane.xlu1 %1333  ;;  %v1458_v11 = vpop.xlane.xlu0 %1457 }
 0x3af   : > { %v2649_v52 = vsub.f32 %v2546_v50, %v1334_v48  ;;  %v1462_v55 = vpop.xlane.xlu2 %1461  ;;  %2003 = vlog2.f32 %v1458_v11 }
 0x3b0   : > { %v1571_v45 = vsub.f32 %v2518_v19, %v1520_v58  ;;  %2005 = vlog2.f32 %v1462_v55 }
 0x3b1   : > { %v2002_v39 = vpop.eup %2001  ;;  %v1429_v56 = vmul.f32 1.442695, %v2649_v52 }
 0x3b2   : > { %1604 = vst.msk [vmem:[%s2556_s17 + $0x60] sm:$0xff] %vm1591_vm2, %v1571_v45  ;;  %1491 = vadd.xlane.f32.xlu2 %v2002_v39 }
 0x3b3   : > { %2007 = vpow2.f32 %v1429_v56 }
 0x3b5   : > { %v2004_v27 = vpop.eup %2003 }
 0x3b6   : > { %v2006_v61 = vpop.eup %2005  ;;  %v1522_v21 = vmul.f32 0.6931472, %v2004_v27  ;;  %v1454_v35 = vpop.xlane.xlu1 %1453 }
 0x3b7   : > { %v1464_v50 = vpop.xlane.xlu0 %1463  ;;  %v1526_v32 = vmul.f32 0.6931472, %v2006_v61  ;;  %2009 = vlog2.f32 %v1454_v35 }
 0x3b8   : > { %v1572_v19 = vsub.f32 %v2526_v28, %v1522_v21  ;;  %2011 = vlog2.f32 %v1464_v50 }
 0x3b9   : > { %v2008_v12 = vpop.eup %2007  ;;  %v1574_v2 = vsub.f32 %v2529_v63, %v1526_v32 }
 0x3ba   : > { %1605 = vst.msk [vmem:[%s2556_s17 + $0x68] sm:$0xff] %vm1591_vm2, %v1572_v19  ;;  %1493 = vadd.xlane.f32.xlu0 %v2008_v12 }
 0x3bb   : > { %1607 = vst.msk [vmem:[%s2556_s17 + $0x78] sm:$0xff] %vm1591_vm2, %v1574_v2 }
 0x3bd   : > { %v2010_v16 = vpop.eup %2009 }
 0x3be   : > { %v2012_v5 = vpop.eup %2011  ;;  %v1518_v30 = vmul.f32 0.6931472, %v2010_v16  ;;  %v1460_v33 = vpop.xlane.xlu1 %1459 }
 0x3bf   : > { %v1528_v9 = vmul.f32 0.6931472, %v2012_v5  ;;  %2013 = vlog2.f32 %v1460_v33 }
 0x3c0   : > { %v1570_v41 = vsub.f32 %v2538_v23, %v1518_v30 }
 0x3c1   : > { %v1575_v28 = vsub.f32 %v2541_v10, %v1528_v9 }
 0x3c2   : > { %1603 = vst.msk [vmem:[%s2556_s17 + $0x58] sm:$0xff] %vm1591_vm2, %v1570_v41 }
 0x3c3   : > { %1608 = vst.msk [vmem:[%s2556_s17 + $0x80] sm:$0xff] %vm1591_vm2, %v1575_v28 }
 0x3c5   : > { %v2014_v63 = vpop.eup %2013  ;;  %v1468_v43 = vpop.xlane.xlu2 %1467 }
 0x3c6   : > { %v1524_v13 = vmul.f32 0.6931472, %v2014_v63  ;;  %2015 = vlog2.f32 %v1468_v43  ;;  %v1466_v17 = vpop.xlane.xlu1 %1465 }
 0x3c7   : > { %2017 = vlog2.f32 %v1466_v17 }
 0x3c8   : > { %v1573_v38 = vsub.f32 %v2551_v7, %v1524_v13 }
 0x3ca   : > { %1606 = vst.msk [vmem:[%s2556_s17 + $0x70] sm:$0xff] %vm1591_vm2, %v1573_v38 }
 0x3cc   : > { %v2016_v23 = vpop.eup %2015 }
 0x3cd   : > { %v2018_v18 = vpop.eup %2017  ;;  %v1532_v10 = vmul.f32 0.6931472, %v2016_v23  ;;  %v1470_v22 = vpop.xlane.xlu0 %1469 }
 0x3ce   : > { %v1530_v8 = vmul.f32 0.6931472, %v2018_v18  ;;  %2019 = vlog2.f32 %v1470_v22 }
 0x3cf   : > { %v1577_v25 = vsub.f32 %v2567_v46, %v1532_v10 }
 0x3d0   : > { %v1576_v62 = vsub.f32 %v2563_v60, %v1530_v8 }
 0x3d1   : > { %1610 = vst.msk [vmem:[%s2556_s17 + $0x90] sm:$0xff] %vm1591_vm2, %v1577_v25 }
 0x3d2   : > { %1609 = vst.msk [vmem:[%s2556_s17 + $0x88] sm:$0xff] %vm1591_vm2, %v1576_v62 }
 0x3d4   : > { %v2020_v4 = vpop.eup %2019 }
 0x3d5   : > { %v1534_v7 = vmul.f32 0.6931472, %v2020_v4  ;;  %v1472_v24 = vpop.xlane.xlu1 %1471 }
 0x3d6   : > { %2021 = vlog2.f32 %v1472_v24 }
 0x3d7   : > { %v1578_v44 = vsub.f32 %v2575_v51, %v1534_v7 }
 0x3d9   : > { %1611 = vst.msk [vmem:[%s2556_s17 + $0x98] sm:$0xff] %vm1591_vm2, %v1578_v44 }
 0x3dc   : > { %v2022_v31 = vpop.eup %2021 }
 0x3dd   : > { %v1536_v26 = vmul.f32 0.6931472, %v2022_v31  ;;  %v1474_v34 = vpop.xlane.xlu2 %1473 }
 0x3de   : > { %2023 = vlog2.f32 %v1474_v34 }
 0x3df   : > { %v1579_v60 = vsub.f32 %v2582_v57, %v1536_v26 }
 0x3e1   : > { %1612 = vst.msk [vmem:[%s2556_s17 + $0xa0] sm:$0xff] %vm1591_vm2, %v1579_v60 }
 0x3e4   : > { %v2024_v46 = vpop.eup %2023 }
 0x3e5   : > { %v1538_v36 = vmul.f32 0.6931472, %v2024_v46  ;;  %v1476_v3 = vpop.xlane.xlu0 %1475 }
 0x3e6   : > { %2025 = vlog2.f32 %v1476_v3 }
 0x3e7   : > { %v1580_v37 = vsub.f32 %v2589_v47, %v1538_v36 }
 0x3e9   : > { %1613 = vst.msk [vmem:[%s2556_s17 + $0xa8] sm:$0xff] %vm1591_vm2, %v1580_v37 }
 0x3ec   : > { %v2026_v51 = vpop.eup %2025 }
 0x3ed   : > { %v1540_v40 = vmul.f32 0.6931472, %v2026_v51  ;;  %v1478_v42 = vpop.xlane.xlu1 %1477 }
 0x3ee   : > { %2027 = vlog2.f32 %v1478_v42 }
 0x3ef   : > { %v1581_v0 = vsub.f32 %v2596_v53, %v1540_v40 }
 0x3f1   : > { %1614 = vst.msk [vmem:[%s2556_s17 + $0xb0] sm:$0xff] %vm1591_vm2, %v1581_v0 }
 0x3f4   : > { %v2028_v57 = vpop.eup %2027 }
 0x3f5   : > { %v1542_v20 = vmul.f32 0.6931472, %v2028_v57  ;;  %v1480_v58 = vpop.xlane.xlu2 %1479 }
 0x3f6   : > { %2029 = vlog2.f32 %v1480_v58 }
 0x3f7   : > { %v1582_v48 = vsub.f32 %v2603_v59, %v1542_v20 }
 0x3f9   : > { %1615 = vst.msk [vmem:[%s2556_s17 + $0xb8] sm:$0xff] %vm1591_vm2, %v1582_v48 }
 0x3fc   : > { %v2030_v47 = vpop.eup %2029 }
 0x3fd   : > { %v1544_v11 = vmul.f32 0.6931472, %v2030_v47  ;;  %v1482_v55 = vpop.xlane.xlu0 %1481 }
 0x3fe   : > { %2031 = vlog2.f32 %v1482_v55 }
 0x3ff   : > { %v1583_v45 = vsub.f32 %v2610_v1, %v1544_v11 }
 0x401   : > { %1616 = vst.msk [vmem:[%s2556_s17 + $0xc0] sm:$0xff] %vm1591_vm2, %v1583_v45 }
 0x404   : > { %v2032_v53 = vpop.eup %2031 }
 0x405   : > { %v1546_v39 = vmul.f32 0.6931472, %v2032_v53  ;;  %v1484_v56 = vpop.xlane.xlu1 %1483 }
 0x406   : > { %2033 = vlog2.f32 %v1484_v56 }
 0x407   : > { %v1584_v27 = vsub.f32 %v2617_v6, %v1546_v39 }
 0x409   : > { %1617 = vst.msk [vmem:[%s2556_s17 + $0xc8] sm:$0xff] %vm1591_vm2, %v1584_v27 }
 0x40c   : > { %v2034_v59 = vpop.eup %2033 }
 0x40d   : > { %v1548_v61 = vmul.f32 0.6931472, %v2034_v59  ;;  %v1486_v21 = vpop.xlane.xlu2 %1485 }
 0x40e   : > { %2035 = vlog2.f32 %v1486_v21 }
 0x40f   : > { %v1585_v35 = vsub.f32 %v2624_v15, %v1548_v61 }
 0x411   : > { %1618 = vst.msk [vmem:[%s2556_s17 + $0xd0] sm:$0xff] %vm1591_vm2, %v1585_v35 }
 0x414   : > { %v2036_v1 = vpop.eup %2035 }
 0x415   : > { %v1550_v50 = vmul.f32 0.6931472, %v2036_v1  ;;  %v1488_v32 = vpop.xlane.xlu0 %1487 }
 0x416   : > { %2037 = vlog2.f32 %v1488_v32 }
 0x417   : > { %v1586_v19 = vsub.f32 %v2631_v29, %v1550_v50 }
 0x419   : > { %1619 = vst.msk [vmem:[%s2556_s17 + $0xd8] sm:$0xff] %vm1591_vm2, %v1586_v19 }
 0x41c   : > { %v2038_v6 = vpop.eup %2037 }
 0x41d   : > { %v1552_v12 = vmul.f32 0.6931472, %v2038_v6  ;;  %v1490_v2 = vpop.xlane.xlu1 %1489 }
 0x41e   : > { %2039 = vlog2.f32 %v1490_v2 }
 0x41f   : > { %v1587_v16 = vsub.f32 %v2637_v54, %v1552_v12 }
 0x421   : > { %1620 = vst.msk [vmem:[%s2556_s17 + $0xe0] sm:$0xff] %vm1591_vm2, %v1587_v16 }
 0x424   : > { %v2040_v15 = vpop.eup %2039 }
 0x425   : > { %v1554_v5 = vmul.f32 0.6931472, %v2040_v15  ;;  %v1492_v30 = vpop.xlane.xlu2 %1491 }
 0x426   : > { %2041 = vlog2.f32 %v1492_v30 }
 0x427   : > { %v1588_v33 = vsub.f32 %v2641_v14, %v1554_v5 }
 0x429   : > { %1621 = vst.msk [vmem:[%s2556_s17 + $0xe8] sm:$0xff] %vm1591_vm2, %v1588_v33 }
 0x42c   : > { %v2042_v29 = vpop.eup %2041 }
 0x42d   : > { %v1556_v9 = vmul.f32 0.6931472, %v2042_v29  ;;  %v1494_v41 = vpop.xlane.xlu0 %1493 }
 0x42e   : > { %2043 = vlog2.f32 %v1494_v41 }
 0x42f   : > { %v1589_v28 = vsub.f32 %v2645_v49, %v1556_v9 }
 0x431   : > { %1622 = vst.msk [vmem:[%s2556_s17 + $0xf0] sm:$0xff] %vm1591_vm2, %v1589_v28 }
 0x434   : > { %v2044_v54 = vpop.eup %2043 }
 0x435   : > { %v1558_v63 = vmul.f32 0.6931472, %v2044_v54 }
 0x437   : > { %v1590_v43 = vsub.f32 %v2649_v52, %v1558_v63 }
 0x439   : > { %1623 = vst.msk [vmem:[%s2556_s17 + $0xf8] sm:$0xff] %vm1591_vm2, %v1590_v43 }
 0x43a PF: > { %s19_s30 = sadd.s32 1, %s2051_s30  }
 0x43b   : > { %p16_p4 = scmp.ge.s32.totalorder %s19_s30, 4  }
 0x43d   :  { %18 = sbr.rel (!%p16_p4) target bundleno = 1 (0x1), region = 86 }

</bundles_post_ra>
